<compile_context>
chip_gen: v7x
topology: tpu7x:2x2x1
jax: 0.10.0
libtpu: 0.0.40
codegen_flags: <defaults>
</compile_context>

<pallas_src>
import jax
import jax.numpy as jnp
from jax import lax
from jax.experimental import pallas as pl
from jax.experimental.pallas import tpu as pltpu


BN_EPS = 1e-5       # nn.BatchNorm1d default eps
L2_EPS = 1e-12      # F.normalize default eps
PROJ_DIM = 64       # fixed by the module (projection head out_features=64)
PROJ_PAD = 128      # lane-dense padded output width inside the kernel


def _bn_relu(h, gamma, beta, inv_b):
    """Training-mode BatchNorm1d (batch stats, biased var) + ReLU, fused affine.

    Single pass over h: per-feature sum and sum-of-squares (two independent
    XLU reductions), variance clamped at 0 before rsqrt (E[x^2]-E[x]^2 can go
    slightly negative from cancellation).  All math stays in f32.
    """
    s = jnp.sum(h, axis=0, keepdims=True)
    ss = jnp.sum(h * h, axis=0, keepdims=True)
    mean = s * inv_b
    var = jnp.maximum(ss * inv_b - mean * mean, 0.0)
    scale = gamma * lax.rsqrt(var + BN_EPS)        # rsqrt -> EUP slot
    offset = beta - mean * scale
    return jnp.maximum(h * scale + offset, 0.0)    # one mul + one add on the BN path


def simclr_kernel(
    x_ref,                       # (B, input_dim) f32 (cast to bf16 in-kernel)
    w1_ref, gb1_ref,             # Linear(input_dim->hidden) bf16, BN gamma/beta (2, hidden) f32
    w2_ref, gb2_ref,             # Linear(hidden->emb)       bf16, BN gamma/beta (2, emb)    f32
    w3_ref, gb3_ref,             # Linear(emb->PROJ_PAD)     bf16, BN gamma/beta (2, PROJ_PAD) f32
    out_ref,                     # (B, PROJ_PAD) f32
):
    inv_b = 1.0 / x_ref.shape[0]       # static batch size, known at trace time
    gb1 = gb1_ref[...]
    gb2 = gb2_ref[...]
    gb3 = gb3_ref[...]

    # ---- backbone layer 1: Linear (bias-free; cancels under training-mode BN) -> BN -> ReLU ----
    h = jnp.dot(x_ref[...].astype(jnp.bfloat16), w1_ref[...],
                preferred_element_type=jnp.float32)
    h = _bn_relu(h, gb1[0:1, :], gb1[1:2, :], inv_b)

    # ---- backbone layer 2: Linear -> BN -> ReLU ----
    h = jnp.dot(h.astype(jnp.bfloat16), w2_ref[...],
                preferred_element_type=jnp.float32)
    h = _bn_relu(h, gb2[0:1, :], gb2[1:2, :], inv_b)

    # ---- projection head: Linear -> BN -> ReLU (padded columns stay exactly 0) ----
    p = jnp.dot(h.astype(jnp.bfloat16), w3_ref[...],
                preferred_element_type=jnp.float32)
    p = _bn_relu(p, gb3[0:1, :], gb3[1:2, :], inv_b)

    # ---- F.normalize(p, p=2, dim=1); zero pad-columns do not affect the norm ----
    sumsq = jnp.sum(p * p, axis=1, keepdims=True)
    inv = lax.rsqrt(jnp.maximum(sumsq, L2_EPS * L2_EPS))   # EUP, no divide
    out_ref[...] = (p * inv).astype(out_ref.dtype)


def _vmem_limit_bytes(B, input_dim, hidden, emb):
    """Scoped-VMEM request sized to the real footprint (with pipeline headroom)."""
    weights = 2 * (input_dim * hidden + hidden * emb + emb * PROJ_PAD)      # bf16
    bn = 4 * 2 * (hidden + emb + PROJ_PAD)                                  # f32 gamma/beta
    x_in = 4 * B * input_dim                                                # f32 x
    out = 4 * B * PROJ_PAD                                                  # f32 out
    acts = 4 * B * (hidden + emb + PROJ_PAD) + 2 * B * (hidden + emb)       # f32 h + bf16 casts
    est = 2 * (weights + bn + x_in + out) + 2 * acts                        # 2x buffering headroom
    # Raise above the 16/32 MiB scoped defaults when needed, but never above
    # v7x's 64 MiB physical VMEM (v5e/v6e have 128 MiB; 64 MiB is the safe cap).
    return int(min(max(est, 32 << 20), 64 << 20))


def simclr_forward(x, kparams):
    """Fused SimCLR forward.

    Returns the lane-dense padded (B, PROJ_PAD=128) f32 output: columns
    0..63 are the L2-normalized projection, columns 64..127 are exactly 0.
    Downstream SimCLR similarity matmuls can consume it directly; slice
    [:, :64] only where a consumer truly needs the narrow layout.
    """
    B, input_dim = x.shape
    hidden = kparams["w1"].shape[1]
    emb = kparams["w2"].shape[1]
    vmem = pl.BlockSpec(memory_space=pltpu.MemorySpace.VMEM)
    args = (
        x,                                   # f32; cast to bf16 inside the kernel
        kparams["w1"], kparams["gb1"],
        kparams["w2"], kparams["gb2"],
        kparams["w3"], kparams["gb3"],
    )
    return pl.pallas_call(
        simclr_kernel,
        out_shape=jax.ShapeDtypeStruct((B, PROJ_PAD), jnp.float32),
        in_specs=[vmem] * len(args),
        out_specs=vmem,
        compiler_params=pltpu.CompilerParams(
            vmem_limit_bytes=_vmem_limit_bytes(B, input_dim, hidden, emb)),
    )(*args)


def init_params(key, input_dim, hidden, emb):
    """PyTorch-like init (uniform Linear, BN gamma=1/beta=0). Kept in f32 for the references."""
    ks = jax.random.split(key, 6)

    def linear(kw, kb, fan_in, fan_out):
        bound = 1.0 / float(fan_in) ** 0.5
        w = jax.random.uniform(kw, (fan_in, fan_out), jnp.float32, -bound, bound)
        b = jax.random.uniform(kb, (1, fan_out), jnp.float32, -bound, bound)
        return w, b

    w1, b1 = linear(ks[0], ks[1], input_dim, hidden)
    w2, b2 = linear(ks[2], ks[3], hidden, emb)
    w3, b3 = linear(ks[4], ks[5], emb, PROJ_DIM)

    return {
        "w1": w1, "b1": b1,
        "g1": jnp.ones((1, hidden), jnp.float32), "be1": jnp.zeros((1, hidden), jnp.float32),
        "w2": w2, "b2": b2,
        "g2": jnp.ones((1, emb), jnp.float32), "be2": jnp.zeros((1, emb), jnp.float32),
        "w3": w3, "b3": b3,
        "g3": jnp.ones((1, PROJ_DIM), jnp.float32), "be3": jnp.zeros((1, PROJ_DIM), jnp.float32),
    }


def pack_kernel_params(p):
    """Kernel-side params: bf16 weights (biases dropped — exact under training-mode BN),
    per-layer (gamma, beta) packed into one (2, N) f32 array, layer-3 padded to 128 lanes."""
    emb = p["w3"].shape[0]
    w3p = jnp.zeros((emb, PROJ_PAD), jnp.float32).at[:, :PROJ_DIM].set(p["w3"])
    g3p = jnp.ones((1, PROJ_PAD), jnp.float32).at[:, :PROJ_DIM].set(p["g3"])
    be3p = jnp.zeros((1, PROJ_PAD), jnp.float32).at[:, :PROJ_DIM].set(p["be3"])
    return {
        "w1": p["w1"].astype(jnp.bfloat16),
        "gb1": jnp.concatenate([p["g1"], p["be1"]], axis=0),
        "w2": p["w2"].astype(jnp.bfloat16),
        "gb2": jnp.concatenate([p["g2"], p["be2"]], axis=0),
        "w3": w3p.astype(jnp.bfloat16),
        "gb3": jnp.concatenate([g3p, be3p], axis=0),
    }


def simclr_ref(x, p, matmul_dtype):
    """Pure-JAX reference with the module's semantics: Linear (with bias), BN in
    training mode (batch stats, biased var), ReLU, L2 normalize.  matmul_dtype
    controls operand precision: bf16 mirrors the kernel's MXU path, f32 is the
    true PyTorch semantics (guards against precision regressions)."""
    def mm(a, w):
        return jnp.dot(a.astype(matmul_dtype), w.astype(matmul_dtype),
                       preferred_element_type=jnp.float32)

    def bn_relu(h, g, b):
        m = jnp.mean(h, axis=0, keepdims=True)
        v = jnp.mean((h - m) ** 2, axis=0, keepdims=True)
        return jnp.maximum((h - m) / jnp.sqrt(v + BN_EPS) * g + b, 0.0)

    h = bn_relu(mm(x, p["w1"]) + p["b1"], p["g1"], p["be1"])
    h = bn_relu(mm(h, p["w2"]) + p["b2"], p["g2"], p["be2"])
    h = bn_relu(mm(h, p["w3"]) + p["b3"], p["g3"], p["be3"])
    n = jnp.maximum(jnp.sqrt(jnp.sum(h * h, axis=1, keepdims=True)), L2_EPS)
    return h / n


if __name__ == "__main__":
    # Small but hardware-friendly shapes: B multiple of 16 (bf16 sublane packing)
    # and >= 128 (fills the MXU M dim on v5e); feature widths multiples of 256
    # (v6e/v7x MXU tile) and of the 128-lane vreg width.
    B, INPUT_DIM, HIDDEN, EMB = 128, 256, 256, 256

    key = jax.random.PRNGKey(0)
    k_x, k_p = jax.random.split(key)
    x = jax.random.normal(k_x, (B, INPUT_DIM), jnp.float32)
    params = init_params(k_p, INPUT_DIM, HIDDEN, EMB)
    kparams = pack_kernel_params(params)

    out_padded = jax.block_until_ready(simclr_forward(x, kparams))
    assert out_padded.shape == (B, PROJ_PAD)

    # Lane-padding columns must be exactly zero (invisible to downstream consumers).
    assert bool(jnp.all(out_padded[:, PROJ_DIM:] == 0.0)), "pad columns not zero"

    out = out_padded[:, :PROJ_DIM]   # test-only slice for comparison vs references

    ref_bf16 = simclr_ref(x, params, jnp.bfloat16)   # mirrors the kernel's MXU precision
    ref_f32 = simclr_ref(x, params, jnp.float32)     # true f32 PyTorch semantics

    assert jnp.allclose(out, ref_bf16, atol=2e-3, rtol=2e-2), "mismatch vs bf16-matmul reference"
    assert jnp.allclose(out, ref_f32, atol=2e-2, rtol=5e-2), "mismatch vs pure-f32 reference"

    print("KERNEL_OK")
</pallas_src>

<mosaic_0001>
module attributes {stable_mosaic.version = 11 : i64} {
  func.func @simclr_kernel(%arg0: memref<128x256xf32, #tpu.memory_space<vmem>>, %arg1: memref<256x256xbf16, #tpu.memory_space<vmem>>, %arg2: memref<2x256xf32, #tpu.memory_space<vmem>>, %arg3: memref<256x256xbf16, #tpu.memory_space<vmem>>, %arg4: memref<2x256xf32, #tpu.memory_space<vmem>>, %arg5: memref<256x128xbf16, #tpu.memory_space<vmem>>, %arg6: memref<2x128xf32, #tpu.memory_space<vmem>>, %arg7: memref<128x128xf32, #tpu.memory_space<vmem>>) attributes {dimension_semantics = [], scalar_prefetch = 0 : i64, scratch_operands = 0 : i64, tpu.core_type = #tpu.core_type<tc>} {
    %c0 = arith.constant 0 : index
    %c0_0 = arith.constant 0 : index
    %0 = vector.load %arg2[%c0, %c0_0] : memref<2x256xf32, #tpu.memory_space<vmem>>, vector<2x256xf32>
    %c0_1 = arith.constant 0 : index
    %c0_2 = arith.constant 0 : index
    %1 = vector.load %arg4[%c0_1, %c0_2] : memref<2x256xf32, #tpu.memory_space<vmem>>, vector<2x256xf32>
    %c0_3 = arith.constant 0 : index
    %c0_4 = arith.constant 0 : index
    %2 = vector.load %arg6[%c0_3, %c0_4] : memref<2x128xf32, #tpu.memory_space<vmem>>, vector<2x128xf32>
    %c0_5 = arith.constant 0 : index
    %c0_6 = arith.constant 0 : index
    %3 = vector.load %arg0[%c0_5, %c0_6] : memref<128x256xf32, #tpu.memory_space<vmem>>, vector<128x256xf32>
    %4 = arith.truncf %3 : vector<128x256xf32> to vector<128x256xbf16>
    %c0_7 = arith.constant 0 : index
    %c0_8 = arith.constant 0 : index
    %5 = vector.load %arg1[%c0_7, %c0_8] : memref<256x256xbf16, #tpu.memory_space<vmem>>, vector<256x256xbf16>
    %cst = arith.constant dense<0.000000e+00> : vector<128x256xf32>
    %6 = tpu.matmul %4, %5, %cst {dimension_numbers = #tpu.dot_dimension_numbers<[1], [0], [0], [1], [0, 0, 1, 1], [], []>} : vector<128x256xbf16>, vector<256x256xbf16>, vector<128x256xf32> -> vector<128x256xf32>
    %7 = vector.extract_strided_slice %0 {offsets = [0, 0], sizes = [1, 256], strides = [1, 1]} : vector<2x256xf32> to vector<1x256xf32>
    %8 = vector.extract_strided_slice %0 {offsets = [1, 0], sizes = [1, 256], strides = [1, 1]} : vector<2x256xf32> to vector<1x256xf32>
    %cst_9 = arith.constant dense<0.000000e+00> : vector<256xf32>
    %9 = vector.multi_reduction <add>, %6, %cst_9 [0] : vector<128x256xf32> to vector<256xf32>
    %10 = vector.shape_cast %9 : vector<256xf32> to vector<1x256xf32>
    %11 = arith.mulf %6, %6 : vector<128x256xf32>
    %cst_10 = arith.constant dense<0.000000e+00> : vector<256xf32>
    %12 = vector.multi_reduction <add>, %11, %cst_10 [0] : vector<128x256xf32> to vector<256xf32>
    %13 = vector.shape_cast %12 : vector<256xf32> to vector<1x256xf32>
    %cst_11 = arith.constant 7.812500e-03 : f32
    %14 = vector.broadcast %cst_11 : f32 to vector<1x256xf32>
    %15 = arith.mulf %10, %14 : vector<1x256xf32>
    %cst_12 = arith.constant 7.812500e-03 : f32
    %16 = vector.broadcast %cst_12 : f32 to vector<1x256xf32>
    %17 = arith.mulf %13, %16 : vector<1x256xf32>
    %18 = arith.mulf %15, %15 : vector<1x256xf32>
    %19 = arith.subf %17, %18 : vector<1x256xf32>
    %cst_13 = arith.constant 0.000000e+00 : f32
    %20 = vector.broadcast %cst_13 : f32 to vector<1x256xf32>
    %21 = arith.maximumf %19, %20 : vector<1x256xf32>
    %cst_14 = arith.constant 9.99999974E-6 : f32
    %22 = vector.broadcast %cst_14 : f32 to vector<1x256xf32>
    %23 = arith.addf %21, %22 : vector<1x256xf32>
    %24 = math.rsqrt %23 : vector<1x256xf32>
    %25 = arith.mulf %7, %24 : vector<1x256xf32>
    %26 = arith.mulf %15, %25 : vector<1x256xf32>
    %27 = arith.subf %8, %26 : vector<1x256xf32>
    %28 = vector.broadcast %25 : vector<1x256xf32> to vector<128x256xf32>
    %29 = arith.mulf %6, %28 : vector<128x256xf32>
    %30 = vector.broadcast %27 : vector<1x256xf32> to vector<128x256xf32>
    %31 = arith.addf %29, %30 : vector<128x256xf32>
    %cst_15 = arith.constant 0.000000e+00 : f32
    %32 = vector.broadcast %cst_15 : f32 to vector<128x256xf32>
    %33 = arith.maximumf %31, %32 : vector<128x256xf32>
    %34 = arith.truncf %33 : vector<128x256xf32> to vector<128x256xbf16>
    %c0_16 = arith.constant 0 : index
    %c0_17 = arith.constant 0 : index
    %35 = vector.load %arg3[%c0_16, %c0_17] : memref<256x256xbf16, #tpu.memory_space<vmem>>, vector<256x256xbf16>
    %cst_18 = arith.constant dense<0.000000e+00> : vector<128x256xf32>
    %36 = tpu.matmul %34, %35, %cst_18 {dimension_numbers = #tpu.dot_dimension_numbers<[1], [0], [0], [1], [0, 0, 1, 1], [], []>} : vector<128x256xbf16>, vector<256x256xbf16>, vector<128x256xf32> -> vector<128x256xf32>
    %37 = vector.extract_strided_slice %1 {offsets = [0, 0], sizes = [1, 256], strides = [1, 1]} : vector<2x256xf32> to vector<1x256xf32>
    %38 = vector.extract_strided_slice %1 {offsets = [1, 0], sizes = [1, 256], strides = [1, 1]} : vector<2x256xf32> to vector<1x256xf32>
    %cst_19 = arith.constant dense<0.000000e+00> : vector<256xf32>
    %39 = vector.multi_reduction <add>, %36, %cst_19 [0] : vector<128x256xf32> to vector<256xf32>
    %40 = vector.shape_cast %39 : vector<256xf32> to vector<1x256xf32>
    %41 = arith.mulf %36, %36 : vector<128x256xf32>
    %cst_20 = arith.constant dense<0.000000e+00> : vector<256xf32>
    %42 = vector.multi_reduction <add>, %41, %cst_20 [0] : vector<128x256xf32> to vector<256xf32>
    %43 = vector.shape_cast %42 : vector<256xf32> to vector<1x256xf32>
    %cst_21 = arith.constant 7.812500e-03 : f32
    %44 = vector.broadcast %cst_21 : f32 to vector<1x256xf32>
    %45 = arith.mulf %40, %44 : vector<1x256xf32>
    %cst_22 = arith.constant 7.812500e-03 : f32
    %46 = vector.broadcast %cst_22 : f32 to vector<1x256xf32>
    %47 = arith.mulf %43, %46 : vector<1x256xf32>
    %48 = arith.mulf %45, %45 : vector<1x256xf32>
    %49 = arith.subf %47, %48 : vector<1x256xf32>
    %cst_23 = arith.constant 0.000000e+00 : f32
    %50 = vector.broadcast %cst_23 : f32 to vector<1x256xf32>
    %51 = arith.maximumf %49, %50 : vector<1x256xf32>
    %cst_24 = arith.constant 9.99999974E-6 : f32
    %52 = vector.broadcast %cst_24 : f32 to vector<1x256xf32>
    %53 = arith.addf %51, %52 : vector<1x256xf32>
    %54 = math.rsqrt %53 : vector<1x256xf32>
    %55 = arith.mulf %37, %54 : vector<1x256xf32>
    %56 = arith.mulf %45, %55 : vector<1x256xf32>
    %57 = arith.subf %38, %56 : vector<1x256xf32>
    %58 = vector.broadcast %55 : vector<1x256xf32> to vector<128x256xf32>
    %59 = arith.mulf %36, %58 : vector<128x256xf32>
    %60 = vector.broadcast %57 : vector<1x256xf32> to vector<128x256xf32>
    %61 = arith.addf %59, %60 : vector<128x256xf32>
    %cst_25 = arith.constant 0.000000e+00 : f32
    %62 = vector.broadcast %cst_25 : f32 to vector<128x256xf32>
    %63 = arith.maximumf %61, %62 : vector<128x256xf32>
    %64 = arith.truncf %63 : vector<128x256xf32> to vector<128x256xbf16>
    %c0_26 = arith.constant 0 : index
    %c0_27 = arith.constant 0 : index
    %65 = vector.load %arg5[%c0_26, %c0_27] : memref<256x128xbf16, #tpu.memory_space<vmem>>, vector<256x128xbf16>
    %cst_28 = arith.constant dense<0.000000e+00> : vector<128x128xf32>
    %66 = tpu.matmul %64, %65, %cst_28 {dimension_numbers = #tpu.dot_dimension_numbers<[1], [0], [0], [1], [0, 0, 1, 1], [], []>} : vector<128x256xbf16>, vector<256x128xbf16>, vector<128x128xf32> -> vector<128x128xf32>
    %67 = vector.extract_strided_slice %2 {offsets = [0, 0], sizes = [1, 128], strides = [1, 1]} : vector<2x128xf32> to vector<1x128xf32>
    %68 = vector.extract_strided_slice %2 {offsets = [1, 0], sizes = [1, 128], strides = [1, 1]} : vector<2x128xf32> to vector<1x128xf32>
    %cst_29 = arith.constant dense<0.000000e+00> : vector<128xf32>
    %69 = vector.multi_reduction <add>, %66, %cst_29 [0] : vector<128x128xf32> to vector<128xf32>
    %70 = vector.shape_cast %69 : vector<128xf32> to vector<1x128xf32>
    %71 = arith.mulf %66, %66 : vector<128x128xf32>
    %cst_30 = arith.constant dense<0.000000e+00> : vector<128xf32>
    %72 = vector.multi_reduction <add>, %71, %cst_30 [0] : vector<128x128xf32> to vector<128xf32>
    %73 = vector.shape_cast %72 : vector<128xf32> to vector<1x128xf32>
    %cst_31 = arith.constant 7.812500e-03 : f32
    %74 = vector.broadcast %cst_31 : f32 to vector<1x128xf32>
    %75 = arith.mulf %70, %74 : vector<1x128xf32>
    %cst_32 = arith.constant 7.812500e-03 : f32
    %76 = vector.broadcast %cst_32 : f32 to vector<1x128xf32>
    %77 = arith.mulf %73, %76 : vector<1x128xf32>
    %78 = arith.mulf %75, %75 : vector<1x128xf32>
    %79 = arith.subf %77, %78 : vector<1x128xf32>
    %cst_33 = arith.constant 0.000000e+00 : f32
    %80 = vector.broadcast %cst_33 : f32 to vector<1x128xf32>
    %81 = arith.maximumf %79, %80 : vector<1x128xf32>
    %cst_34 = arith.constant 9.99999974E-6 : f32
    %82 = vector.broadcast %cst_34 : f32 to vector<1x128xf32>
    %83 = arith.addf %81, %82 : vector<1x128xf32>
    %84 = math.rsqrt %83 : vector<1x128xf32>
    %85 = arith.mulf %67, %84 : vector<1x128xf32>
    %86 = arith.mulf %75, %85 : vector<1x128xf32>
    %87 = arith.subf %68, %86 : vector<1x128xf32>
    %88 = vector.broadcast %85 : vector<1x128xf32> to vector<128x128xf32>
    %89 = arith.mulf %66, %88 : vector<128x128xf32>
    %90 = vector.broadcast %87 : vector<1x128xf32> to vector<128x128xf32>
    %91 = arith.addf %89, %90 : vector<128x128xf32>
    %cst_35 = arith.constant 0.000000e+00 : f32
    %92 = vector.broadcast %cst_35 : f32 to vector<128x128xf32>
    %93 = arith.maximumf %91, %92 : vector<128x128xf32>
    %94 = arith.mulf %93, %93 : vector<128x128xf32>
    %cst_36 = arith.constant dense<0.000000e+00> : vector<128xf32>
    %95 = vector.multi_reduction <add>, %94, %cst_36 [1] : vector<128x128xf32> to vector<128xf32>
    %96 = vector.shape_cast %95 : vector<128xf32> to vector<128x1xf32>
    %cst_37 = arith.constant 1.000000e-24 : f32
    %97 = vector.broadcast %cst_37 : f32 to vector<128x1xf32>
    %98 = arith.maximumf %96, %97 : vector<128x1xf32>
    %99 = math.rsqrt %98 : vector<128x1xf32>
    %100 = vector.broadcast %99 : vector<128x1xf32> to vector<128x128xf32>
    %101 = arith.mulf %93, %100 : vector<128x128xf32>
    %c0_38 = arith.constant 0 : index
    %c0_39 = arith.constant 0 : index
    %102 = vector.load %arg7[%c0_38, %c0_39] : memref<128x128xf32, #tpu.memory_space<vmem>>, vector<128x128xf32>
    tpu.vector_store %arg7[%c0_38, %c0_39], %101 {strides = array<i32>} : memref<128x128xf32, #tpu.memory_space<vmem>>, vector<128x128xf32>,
    return
  }
}

</mosaic_0001>

<bundles_post_ra>
// kernel: tpu_custom_call.1
= control target key start
LH: loop header
LB: loop body
LE: loop exit
PB: predicated region body
PF: predicated region fallthrough
CT: control target
= control target key end

     0   :  { %12 = vsyncpa [#allocation3], 0  ;;  %s3159_s0 = inlined_call_operand.hbm [shape: f32[128,256], index: 0, kind: input, shape index: {}]   ;;  %s3160_s1 = inlined_call_operand.hbm [shape: bf16[256,256], index: 1, kind: input, shape index: {}]   ;;  %s3161_s2 = inlined_call_operand.vmem [shape: f32[2,256], index: 2, kind: input, shape index: {}]   ;;  %s3162_s3 = inlined_call_operand.hbm [shape: bf16[256,256], index: 3, kind: input, shape index: {}]   ;;  %s3163_s4 = inlined_call_operand.vmem [shape: f32[2,256], index: 4, kind: input, shape index: {}]   ;;  %s3164_s5 = inlined_call_operand.hbm [shape: bf16[256,128], index: 5, kind: input, shape index: {}]   ;;  %s3165_s6 = inlined_call_operand.vmem [shape: f32[2,128], index: 6, kind: input, shape index: {}]   ;;  %s3166_s7 = inlined_call_operand.hbm [shape: f32[128,128], index: 7, kind: output, shape index: {}]  }
   0x1   :  { %13 = vsyncpa [#allocation6], 0 }
   0x2   :  { %14 = vsyncpa [#allocation9], 0 }
   0x3   :  { %15 = vsyncpa [#allocation4], 0  ;;  %s2285_s24 = smov [#allocation5]   ;;  %s2167_s28 = scalar_lea.hbm %s3160_s1, 4096 }
   0x4   :  { %s33_s25 = sshll.u32 %s2285_s24, 4  ;;  %p2168_p0 = scmp.ne.s32.totalorder %s3160_s1, %s2167_s28  ;;  %s34_s25 = int_to_ptr.vmem [resolvable:$true] %s33_s25 }
   0x5   :  { %p2171_p1 = scmp.lt.u32.totalorder %s2167_s28, %s3160_s1 }
   0x7   :  { %p2173_p2 = pnand %p2171_p1, %p2168_p0 }
   0x9   :  { %2176 = shalt.err (!%p2173_p2)
}
   0xa   :  { %s2177_s10 = scalar_lea.vmem %s34_s25, 4096  ;;  %p2182_p4 = scmp.lt.s32.totalorder %s34_s25, %s34_s25 }
   0xb   :  { %p2178_p3 = scmp.ne.s32.totalorder %s34_s25, %s2177_s10  ;;  %p2183_p5 = scmp.lt.s32.totalorder %s2177_s10, %s2177_s10 }
   0xd   :  { %p2184_p6 = por %p2183_p5, %p2182_p4 }
   0xf   :  { %p2185_p7 = pnand %p2184_p6, %p2178_p3 }
  0x11   :  { %2188 = shalt.err (!%p2185_p7)
}
  0x12   :  { %s2286_s11 = smov 128   ;;  %s2287_s12 = smov 8  }
  0x13   :  { %39 = dma.hbm_to_vmem [thread:$0]  %s3160_s1, 4096, %s34_s25, [#allocation6], %s2286_s11, %s2286_s11, %s2287_s12  }
  0x14   :  { %s2288_s15 = smov [#allocation2]   ;;  %s2189_s19 = scalar_lea.hbm %s3159_s0, 4096 }
  0x15   :  { %s21_s16 = sshll.u32 %s2288_s15, 4  ;;  %p2190_p8 = scmp.ne.s32.totalorder %s3159_s0, %s2189_s19  ;;  %s22_s16 = int_to_ptr.vmem [resolvable:$true] %s21_s16 }
  0x16   :  { %p2193_p9 = scmp.lt.u32.totalorder %s2189_s19, %s3159_s0 }
  0x18   :  { %p2195_p10 = pnand %p2193_p9, %p2190_p8 }
  0x1a   :  { %2198 = shalt.err (!%p2195_p10)
}
  0x1b   :  { %s2199_s24 = scalar_lea.vmem %s22_s16, 4096  ;;  %p2204_p12 = scmp.lt.s32.totalorder %s22_s16, %s22_s16 }
  0x1c   :  { %p2200_p11 = scmp.ne.s32.totalorder %s22_s16, %s2199_s24  ;;  %p2205_p13 = scmp.lt.s32.totalorder %s2199_s24, %s2199_s24 }
  0x1e   :  { %p2206_p0 = por %p2205_p13, %p2204_p12 }
  0x20   :  { %p2207_p1 = pnand %p2206_p0, %p2200_p11 }
  0x22   :  { %2210 = shalt.err (!%p2207_p1)
}
  0x23   :  { %s2289_s1 = smov 256   ;;  %s2290_s25 = smov 16  }
  0x24   :  { %27 = dma.hbm_to_vmem [thread:$0]  %s3159_s0, 4096, %s22_s16, [#allocation3], %s2289_s1, %s2289_s1, %s2290_s25  }
  0x25   :  { %s2291_s28 = smov [#allocation7]   ;;  %s2292_s30 = smov [#allocation8]  }
  0x26   :  { %s47_s29 = sshll.u32 %s2291_s28, 4  ;;  %s61_s8 = sshll.u32 %s2292_s30, 4  ;;  %s48_s29 = int_to_ptr.vmem [resolvable:$true] %s47_s29  ;;  %s2364_s8 = int_to_ptr.vmem [resolvable:$true] %s61_s8 }
  0x27   :  { %s2211_s13 = scalar_lea.hbm %s3162_s3, 4096 }
  0x28   :  { %p2212_p2 = scmp.ne.s32.totalorder %s3162_s3, %s2211_s13  ;;  %p2215_p3 = scmp.lt.u32.totalorder %s2211_s13, %s3162_s3 }
  0x2a   :  { %p2217_p4 = pnand %p2215_p3, %p2212_p2 }
  0x2c   :  { %2220 = shalt.err (!%p2217_p4)
}
  0x2d   :  { %s2221_s0 = scalar_lea.vmem %s48_s29, 4096  ;;  %p2226_p6 = scmp.lt.s32.totalorder %s48_s29, %s48_s29 }
  0x2e   :  { %p2222_p5 = scmp.ne.s32.totalorder %s48_s29, %s2221_s0  ;;  %p2227_p7 = scmp.lt.s32.totalorder %s2221_s0, %s2221_s0 }
  0x30   :  { %p2228_p8 = por %p2227_p7, %p2226_p6 }
  0x32   :  { %p2229_p9 = pnand %p2228_p8, %p2222_p5 }
  0x34   :  { %2232 = shalt.err (!%p2229_p9)
}
  0x35   :  { %53 = dma.hbm_to_vmem [thread:$0]  %s3162_s3, 4096, %s48_s29, [#allocation6], %s2286_s11, %s2286_s11, %s2287_s12  }
  0x36   :  { %s2233_s22 = scalar_lea.hbm %s3164_s5, 2048 }
  0x37   :  { %p2234_p10 = scmp.ne.s32.totalorder %s3164_s5, %s2233_s22  ;;  %p2237_p11 = scmp.lt.u32.totalorder %s2233_s22, %s3164_s5 }
  0x39   :  { %p2239_p12 = pnand %p2237_p11, %p2234_p10 }
  0x3b   :  { %2242 = shalt.err (!%p2239_p12)
}
  0x3c   :  { %s2243_s26 = scalar_lea.vmem %s2364_s8, 2048  ;;  %p2248_p0 = scmp.lt.s32.totalorder %s2364_s8, %s2364_s8 }
  0x3d   :  { %p2244_p13 = scmp.ne.s32.totalorder %s2364_s8, %s2243_s26  ;;  %p2249_p1 = scmp.lt.s32.totalorder %s2243_s26, %s2243_s26 }
  0x3f   :  { %p2250_p2 = por %p2249_p1, %p2248_p0 }
  0x41   :  { %p2251_p3 = pnand %p2250_p2, %p2244_p13 }
  0x43   :  { %2254 = shalt.err (!%p2251_p3)
}
  0x44   :  { %s2293_s3 = smov 64   ;;  %s2294_s27 = smov 4  }
  0x45   :  { %67 = dma.hbm_to_vmem [thread:$0]  %s3164_s5, 2048, %s2364_s8, [#allocation9], %s2293_s3, %s2293_s3, %s2294_s27  }
  0x46   :  { %2277 = dma.done.wait [#allocation3], 4096  }
  0x47   :  { %2278 = vsyncadd [#allocation3], 4294963200 }
  0x48   :  { %2279 = dma.done.wait [#allocation6], 8192  }
  0x49   :  { %2280 = vsyncadd [#allocation6], 4294959104 }
  0x4a   :  { %2281 = dma.done.wait [#allocation9], 2048  }
  0x4b   :  { %2282 = vsyncadd [#allocation9], 4294965248  ;;  %v2013_v0 = vld [vmem:[#allocation5 + $0x4] ss:$8 sps:$4 sm:$0xff]   ;;  %v2015_v1 = vld [vmem:[#allocation5] ss:$8 sps:$4 sm:$0xff]  }
  0x4c   :  { %326 = vmatprep.subr.bf16.mxu0 %v2013_v0  ;;  %v2016_v2 = vld [vmem:[#allocation5 + $0x14] ss:$8 sps:$4 sm:$0xff]   ;;  %v2018_v3 = vld [vmem:[#allocation5 + $0x10] ss:$8 sps:$4 sm:$0xff]   ;;  %v2019_v4 = vld [vmem:[#allocation5 + $0x24] ss:$8 sps:$4 sm:$0xff]  }
  0x4d   :  { %327 = vmatpush1.bf16.msra.mxu0 %v2015_v1  ;;  %v2021_v5 = vld [vmem:[#allocation5 + $0x20] ss:$8 sps:$4 sm:$0xff]   ;;  %v2022_v6 = vld [vmem:[#allocation5 + $0x34] ss:$8 sps:$4 sm:$0xff]   ;;  %v2024_v7 = vld [vmem:[#allocation5 + $0x30] ss:$8 sps:$4 sm:$0xff]  }
  0x4e   :  { %328 = vmatprep.subr.bf16.mxu0 %v2016_v2  ;;  %v2025_v8 = vld [vmem:[#allocation5 + $0x44] ss:$8 sps:$4 sm:$0xff]   ;;  %v2027_v9 = vld [vmem:[#allocation5 + $0x40] ss:$8 sps:$4 sm:$0xff]   ;;  %v2028_v10 = vld [vmem:[#allocation5 + $0x54] ss:$8 sps:$4 sm:$0xff]  }
  0x4f   :  { %v2030_v11 = vld [vmem:[#allocation5 + $0x50] ss:$8 sps:$4 sm:$0xff]   ;;  %v2031_v12 = vld [vmem:[#allocation5 + $0x64] ss:$8 sps:$4 sm:$0xff]   ;;  %v2033_v16 = vld [vmem:[#allocation5 + $0x60] ss:$8 sps:$4 sm:$0xff]  }
  0x50   :  { %v87_v13 = vld [vmem:[#allocation2 + $0x8] sm:$0xff]  ;;  %v89_v14 = vld [vmem:[#allocation2 + $0x18] sm:$0xff]  ;;  %v86_v35 = vld [vmem:[#allocation2] sm:$0xff] }
  0x51   :  { %329 = vmatpush1.bf16.msra.mxu0 %v2018_v3  ;;  %v119_v15 = vpack.c.bf16 %v89_v14, %v87_v13  ;;  %v2034_v17 = vld [vmem:[#allocation5 + $0x74] ss:$8 sps:$4 sm:$0xff]   ;;  %v2036_v18 = vld [vmem:[#allocation5 + $0x70] ss:$8 sps:$4 sm:$0xff]   ;;  %v2037_v19 = vld [vmem:[#allocation5 + $0x84] ss:$8 sps:$4 sm:$0xff]  }
  0x52   :  { %330 = vmatprep.subr.bf16.mxu0 %v2019_v4  ;;  %v2039_v20 = vld [vmem:[#allocation5 + $0x80] ss:$8 sps:$4 sm:$0xff]   ;;  %v2040_v21 = vld [vmem:[#allocation5 + $0x94] ss:$8 sps:$4 sm:$0xff]   ;;  %v2042_v22 = vld [vmem:[#allocation5 + $0x90] ss:$8 sps:$4 sm:$0xff]  }
  0x53   :  { %358 = vmatprep.mubr.bf16.mxu0 %v119_v15  ;;  %v2043_v23 = vld [vmem:[#allocation5 + $0xa4] ss:$8 sps:$4 sm:$0xff]   ;;  %v2045_v24 = vld [vmem:[#allocation5 + $0xa0] ss:$8 sps:$4 sm:$0xff]   ;;  %v2046_v25 = vld [vmem:[#allocation5 + $0xb4] ss:$8 sps:$4 sm:$0xff]  }
  0x54   :  { %v2048_v26 = vld [vmem:[#allocation5 + $0xb0] ss:$8 sps:$4 sm:$0xff]   ;;  %v2049_v27 = vld [vmem:[#allocation5 + $0xc4] ss:$8 sps:$4 sm:$0xff]   ;;  %v2051_v28 = vld [vmem:[#allocation5 + $0xc0] ss:$8 sps:$4 sm:$0xff]  }
  0x55   :  { %331 = vmatpush1.bf16.msra.mxu0 %v2021_v5  ;;  %v2052_v29 = vld [vmem:[#allocation5 + $0xd4] ss:$8 sps:$4 sm:$0xff]   ;;  %v2054_v30 = vld [vmem:[#allocation5 + $0xd0] ss:$8 sps:$4 sm:$0xff]   ;;  %v2055_v31 = vld [vmem:[#allocation5 + $0xe4] ss:$8 sps:$4 sm:$0xff]  }
  0x56   :  { %332 = vmatprep.subr.bf16.mxu0 %v2022_v6  ;;  %v2057_v32 = vld [vmem:[#allocation5 + $0xe0] ss:$8 sps:$4 sm:$0xff]   ;;  %v2058_v33 = vld [vmem:[#allocation5 + $0xf4] ss:$8 sps:$4 sm:$0xff]   ;;  %v2060_v34 = vld [vmem:[#allocation5 + $0xf0] ss:$8 sps:$4 sm:$0xff]  }
  0x57   :  { %v88_v36 = vld [vmem:[#allocation2 + $0x10] sm:$0xff]  ;;  %v91_v37 = vld [vmem:[#allocation2 + $0x28] sm:$0xff]  ;;  %v93_v38 = vld [vmem:[#allocation2 + $0x38] sm:$0xff] }
  0x58   :  { %v118_v39 = vpack.c.bf16 %v88_v36, %v86_v35  ;;  %v121_v40 = vpack.c.bf16 %v93_v38, %v91_v37  ;;  %v90_v41 = vld [vmem:[#allocation2 + $0x20] sm:$0xff]  ;;  %v92_v42 = vld [vmem:[#allocation2 + $0x30] sm:$0xff]  ;;  %v95_v43 = vld [vmem:[#allocation2 + $0x48] sm:$0xff] }
  0x59   :  { %333 = vmatpush1.bf16.msra.mxu0 %v2024_v7  ;;  %v97_v44 = vld [vmem:[#allocation2 + $0x58] sm:$0xff]  ;;  %v120_v45 = vpack.c.bf16 %v92_v42, %v90_v41  ;;  %v94_v47 = vld [vmem:[#allocation2 + $0x40] sm:$0xff]  ;;  %v96_v48 = vld [vmem:[#allocation2 + $0x50] sm:$0xff] }
  0x5a   :  { %334 = vmatprep.subr.bf16.mxu0 %v2025_v8  ;;  %v123_v46 = vpack.c.bf16 %v97_v44, %v95_v43  ;;  %v99_v49 = vld [vmem:[#allocation2 + $0x68] sm:$0xff]  ;;  %v101_v50 = vld [vmem:[#allocation2 + $0x78] sm:$0xff]  ;;  %v122_v51 = vpack.c.bf16 %v96_v48, %v94_v47  ;;  %v98_v53 = vld [vmem:[#allocation2 + $0x60] sm:$0xff] }
  0x5b   :  { %v125_v52 = vpack.c.bf16 %v101_v50, %v99_v49  ;;  %v100_v54 = vld [vmem:[#allocation2 + $0x70] sm:$0xff]  ;;  %v103_v55 = vld [vmem:[#allocation2 + $0x88] sm:$0xff]  ;;  %v105_v56 = vld [vmem:[#allocation2 + $0x98] sm:$0xff] }
  0x5c   :  { %v124_v57 = vpack.c.bf16 %v100_v54, %v98_v53  ;;  %v127_v58 = vpack.c.bf16 %v105_v56, %v103_v55  ;;  %v102_v59 = vld [vmem:[#allocation2 + $0x80] sm:$0xff]  ;;  %v104_v60 = vld [vmem:[#allocation2 + $0x90] sm:$0xff]  ;;  %v107_v61 = vld [vmem:[#allocation2 + $0xa8] sm:$0xff] }
  0x5d   :  { %335 = vmatpush1.bf16.msra.mxu0 %v2027_v9  ;;  %v109_v62 = vld [vmem:[#allocation2 + $0xb8] sm:$0xff]  ;;  %v126_v63 = vpack.c.bf16 %v104_v60, %v102_v59  ;;  %v106_v1 = vld [vmem:[#allocation2 + $0xa0] sm:$0xff]  ;;  %v108_v2 = vld [vmem:[#allocation2 + $0xb0] sm:$0xff] }
  0x5e   :  { %336 = vmatprep.subr.bf16.mxu0 %v2028_v10  ;;  %v129_v0 = vpack.c.bf16 %v109_v62, %v107_v61  ;;  %v111_v3 = vld [vmem:[#allocation2 + $0xc8] sm:$0xff]  ;;  %v113_v4 = vld [vmem:[#allocation2 + $0xd8] sm:$0xff]  ;;  %v128_v5 = vpack.c.bf16 %v108_v2, %v106_v1  ;;  %v110_v7 = vld [vmem:[#allocation2 + $0xc0] sm:$0xff] }
  0x5f   :  { %v131_v6 = vpack.c.bf16 %v113_v4, %v111_v3  ;;  %v112_v8 = vld [vmem:[#allocation2 + $0xd0] sm:$0xff]  ;;  %v115_v9 = vld [vmem:[#allocation2 + $0xe8] sm:$0xff]  ;;  %v117_v10 = vld [vmem:[#allocation2 + $0xf8] sm:$0xff] }
  0x60   :  { %v114_v13 = vld [vmem:[#allocation2 + $0xe0] sm:$0xff]  ;;  %v116_v14 = vld [vmem:[#allocation2 + $0xf0] sm:$0xff] }
  0x61   :  { %337 = vmatpush1.bf16.msra.mxu0 %v2030_v11  ;;  %v130_v11 = vpack.c.bf16 %v112_v8, %v110_v7  ;;  %v132_v15 = vpack.c.bf16 %v116_v14, %v114_v13  ;;  %v2090_v35 = vld [vmem:[#allocation7 + $0x90] ss:$8 sps:$4 sm:$0xff]   ;;  %v2091_v36 = vld [vmem:[#allocation7 + $0xa4] ss:$8 sps:$4 sm:$0xff]   ;;  %v2093_v37 = vld [vmem:[#allocation7 + $0xa0] ss:$8 sps:$4 sm:$0xff]  }
  0x62   :  { %338 = vmatprep.subr.bf16.mxu0 %v2031_v12  ;;  %v133_v12 = vpack.c.bf16 %v117_v10, %v115_v9  ;;  %v2094_v38 = vld [vmem:[#allocation7 + $0xb4] ss:$8 sps:$4 sm:$0xff]   ;;  %v2099_v41 = vld [vmem:[#allocation7 + $0xc0] ss:$8 sps:$4 sm:$0xff]   ;;  %v2102_v43 = vld [vmem:[#allocation7 + $0xd0] ss:$8 sps:$4 sm:$0xff]  }
  0x63   :  { %v2100_v42 = vld [vmem:[#allocation7 + $0xd4] ss:$8 sps:$4 sm:$0xff]   ;;  %v2103_v44 = vld [vmem:[#allocation7 + $0xe4] ss:$8 sps:$4 sm:$0xff]   ;;  %v2108_v47 = vld [vmem:[#allocation7 + $0xf0] ss:$8 sps:$4 sm:$0xff]  }
  0x65   :  { %339 = vmatpush1.bf16.msra.mxu0 %v2033_v16  ;;  %v2061_v16 = vld [vmem:[#allocation7 + $0x4] ss:$8 sps:$4 sm:$0xff]  }
  0x66   :  { %340 = vmatprep.subr.bf16.mxu0 %v2034_v17  ;;  %v2063_v17 = vld [vmem:[#allocation7] ss:$8 sps:$4 sm:$0xff]   ;;  %938 = vmatprep.subr.bf16.mxu1 %v2061_v16 }
  0x67   :  { %939 = vmatpush1.bf16.msra.mxu1 %v2063_v17 }
  0x69   :  { %341 = vmatpush1.bf16.msra.mxu0 %v2036_v18  ;;  %v2064_v18 = vld [vmem:[#allocation7 + $0x14] ss:$8 sps:$4 sm:$0xff]  }
  0x6a   :  { %342 = vmatprep.subr.bf16.mxu0 %v2037_v19  ;;  %v2066_v19 = vld [vmem:[#allocation7 + $0x10] ss:$8 sps:$4 sm:$0xff]   ;;  %940 = vmatprep.subr.bf16.mxu1 %v2064_v18 }
  0x6b   :  { %941 = vmatpush1.bf16.msra.mxu1 %v2066_v19 }
  0x6d   :  { %343 = vmatpush1.bf16.msra.mxu0 %v2039_v20  ;;  %v2067_v20 = vld [vmem:[#allocation7 + $0x24] ss:$8 sps:$4 sm:$0xff]  }
  0x6e   :  { %344 = vmatprep.subr.bf16.mxu0 %v2040_v21  ;;  %v2069_v21 = vld [vmem:[#allocation7 + $0x20] ss:$8 sps:$4 sm:$0xff]   ;;  %942 = vmatprep.subr.bf16.mxu1 %v2067_v20 }
  0x6f   :  { %943 = vmatpush1.bf16.msra.mxu1 %v2069_v21 }
  0x71   :  { %345 = vmatpush1.bf16.msra.mxu0 %v2042_v22  ;;  %v2070_v22 = vld [vmem:[#allocation7 + $0x34] ss:$8 sps:$4 sm:$0xff]  }
  0x72   :  { %346 = vmatprep.subr.bf16.mxu0 %v2043_v23  ;;  %v2072_v23 = vld [vmem:[#allocation7 + $0x30] ss:$8 sps:$4 sm:$0xff]   ;;  %944 = vmatprep.subr.bf16.mxu1 %v2070_v22 }
  0x73   :  { %945 = vmatpush1.bf16.msra.mxu1 %v2072_v23 }
  0x75   :  { %347 = vmatpush1.bf16.msra.mxu0 %v2045_v24  ;;  %v2073_v24 = vld [vmem:[#allocation7 + $0x44] ss:$8 sps:$4 sm:$0xff]  }
  0x76   :  { %348 = vmatprep.subr.bf16.mxu0 %v2046_v25  ;;  %v2075_v25 = vld [vmem:[#allocation7 + $0x40] ss:$8 sps:$4 sm:$0xff]   ;;  %946 = vmatprep.subr.bf16.mxu1 %v2073_v24 }
  0x77   :  { %947 = vmatpush1.bf16.msra.mxu1 %v2075_v25 }
  0x79   :  { %349 = vmatpush1.bf16.msra.mxu0 %v2048_v26  ;;  %v2076_v26 = vld [vmem:[#allocation7 + $0x54] ss:$8 sps:$4 sm:$0xff]  }
  0x7a   :  { %350 = vmatprep.subr.bf16.mxu0 %v2049_v27  ;;  %v2078_v27 = vld [vmem:[#allocation7 + $0x50] ss:$8 sps:$4 sm:$0xff]   ;;  %948 = vmatprep.subr.bf16.mxu1 %v2076_v26 }
  0x7b   :  { %949 = vmatpush1.bf16.msra.mxu1 %v2078_v27 }
  0x7d   :  { %351 = vmatpush1.bf16.msra.mxu0 %v2051_v28  ;;  %v2079_v28 = vld [vmem:[#allocation7 + $0x64] ss:$8 sps:$4 sm:$0xff]  }
  0x7e   :  { %352 = vmatprep.subr.bf16.mxu0 %v2052_v29  ;;  %v2081_v29 = vld [vmem:[#allocation7 + $0x60] ss:$8 sps:$4 sm:$0xff]   ;;  %950 = vmatprep.subr.bf16.mxu1 %v2079_v28 }
  0x7f   :  { %951 = vmatpush1.bf16.msra.mxu1 %v2081_v29 }
  0x81   :  { %353 = vmatpush1.bf16.msra.mxu0 %v2054_v30  ;;  %v2082_v30 = vld [vmem:[#allocation7 + $0x74] ss:$8 sps:$4 sm:$0xff]  }
  0x82   :  { %354 = vmatprep.subr.bf16.mxu0 %v2055_v31  ;;  %v2084_v31 = vld [vmem:[#allocation7 + $0x70] ss:$8 sps:$4 sm:$0xff]   ;;  %952 = vmatprep.subr.bf16.mxu1 %v2082_v30 }
  0x83   :  { %953 = vmatpush1.bf16.msra.mxu1 %v2084_v31 }
  0x85   :  { %355 = vmatpush1.bf16.msra.mxu0 %v2057_v32  ;;  %v2085_v32 = vld [vmem:[#allocation7 + $0x84] ss:$8 sps:$4 sm:$0xff]  }
  0x86   :  { %356 = vmatprep.subr.bf16.mxu0 %v2058_v33  ;;  %v2087_v33 = vld [vmem:[#allocation7 + $0x80] ss:$8 sps:$4 sm:$0xff]   ;;  %954 = vmatprep.subr.bf16.mxu1 %v2085_v32 }
  0x87   :  { %955 = vmatpush1.bf16.msra.mxu1 %v2087_v33 }
  0x89   :  { %357 = vmatpush1.bf16.msra.mxu0 %v2060_v34  ;;  %v2088_v34 = vld [vmem:[#allocation7 + $0x94] ss:$8 sps:$4 sm:$0xff]  }
  0x8a   :  { %956 = vmatprep.subr.bf16.mxu1 %v2088_v34 }
  0x8b   :  { %957 = vmatpush1.bf16.msra.mxu1 %v2090_v35 }
  0x8c   :  { %359 = vmatmul.mubr.bf16.vlgmr.msra.gmra.mrb[0].mxu0 %v118_v39  ;;  %958 = vmatprep.subr.bf16.mxu1 %v2091_v36  ;;  %v2096_v39 = vld [vmem:[#allocation7 + $0xb0] ss:$8 sps:$4 sm:$0xff]  }
  0x8d   :  { %368 = vmatprep.mubr.bf16.mxu0 %v121_v40  ;;  %v2097_v40 = vld [vmem:[#allocation7 + $0xc4] ss:$8 sps:$4 sm:$0xff]  }
  0x8f   :  { %959 = vmatpush1.bf16.msra.mxu1 %v2093_v37 }
  0x90   :  { %960 = vmatprep.subr.bf16.mxu1 %v2094_v38 }
  0x93   :  { %961 = vmatpush1.bf16.msra.mxu1 %v2096_v39 }
  0x94   :  { %369 = vmatmul.mubr.bf16.gmra.mrb[4].mxu0 %v120_v45  ;;  %962 = vmatprep.subr.bf16.mxu1 %v2097_v40  ;;  %v2105_v45 = vld [vmem:[#allocation7 + $0xe0] ss:$8 sps:$4 sm:$0xff]  }
  0x95   :  { %378 = vmatprep.mubr.bf16.mxu0 %v123_v46  ;;  %v2106_v46 = vld [vmem:[#allocation7 + $0xf4] ss:$8 sps:$4 sm:$0xff]  }
  0x97   :  { %963 = vmatpush1.bf16.msra.mxu1 %v2099_v41 }
  0x98   :  { %964 = vmatprep.subr.bf16.mxu1 %v2100_v42 }
  0x9b   :  { %965 = vmatpush1.bf16.msra.mxu1 %v2102_v43 }
  0x9c   :  { %379 = vmatmul.mubr.bf16.gmra.mrb[8].mxu0 %v122_v51  ;;  %966 = vmatprep.subr.bf16.mxu1 %v2103_v44 }
  0x9d   :  { %388 = vmatprep.mubr.bf16.mxu0 %v125_v52 }
  0x9f   :  { %967 = vmatpush1.bf16.msra.mxu1 %v2105_v45 }
  0xa0   :  { %968 = vmatprep.subr.bf16.mxu1 %v2106_v46 }
  0xa3   :  { %969 = vmatpush1.bf16.msra.mxu1 %v2108_v47 }
  0xa4   :  { %389 = vmatmul.mubr.bf16.gmra.mrb[12].mxu0 %v124_v57 }
  0xa5   :  { %398 = vmatprep.mubr.bf16.mxu0 %v127_v58 }
  0xac   :  { %399 = vmatmul.mubr.bf16.gmra.mrb[16].mxu0 %v126_v63 }
  0xad   :  { %408 = vmatprep.mubr.bf16.mxu0 %v129_v0 }
  0xb4   :  { %409 = vmatmul.mubr.bf16.gmra.mrb[20].mxu0 %v128_v5 }
  0xb5   :  { %418 = vmatprep.mubr.bf16.mxu0 %v131_v6 }
  0xbc   :  { %419 = vmatmul.mubr.bf16.gmra.mrb[24].mxu0 %v130_v11 }
  0xbd   :  { %428 = vmatprep.mubr.bf16.mxu0 %v133_v12 }
  0xc4   :  { %429 = vmatmul.mubr.bf16.gmra.mrb[28].mxu0 %v132_v15 }
 0x15f   :  { %v2398_v48 = vpop.f32.mrb[0].mxu0 }
 0x160   :  { %v2400_v49 = vpop.f32.mrb[1].mxu0  ;;  %v481_v51 = vmul.f32 %v2398_v48, %v2398_v48 }
 0x161   :  { %v2402_v50 = vpop.f32.mrb[2].mxu0  ;;  %v482_v55 = vmul.f32 %v2400_v49, %v2400_v49 }
 0x162   :  { %v439_v52 = vadd.f32 %v2402_v50, %v2398_v48  ;;  %v483_v53 = vmul.f32 %v2402_v50, %v2402_v50  ;;  %v2410_v54 = vpop.f32.mrb[3].mxu0 }
 0x163   :  { %v460_v56 = vadd.f32 %v2410_v54, %v2400_v49  ;;  %v484_v57 = vmul.f32 %v2410_v54, %v2410_v54 }
 0x164   :  { %v513_v58 = vadd.f32 %v483_v53, %v481_v51 }
 0x165   :  { %v534_v59 = vadd.f32 %v484_v57, %v482_v55 }
 0x167   :  { %v2418_v60 = vpop.f32.mrb[4].mxu0 }
 0x168   :  { %v440_v61 = vadd.f32 %v439_v52, %v2418_v60  ;;  %v485_v62 = vmul.f32 %v2418_v60, %v2418_v60  ;;  %v2423_v63 = vpop.f32.mrb[5].mxu0 }
 0x169   :  { %v461_v0 = vadd.f32 %v460_v56, %v2423_v63  ;;  %v486_v1 = vmul.f32 %v2423_v63, %v2423_v63  ;;  %v2428_v2 = vpop.f32.mrb[6].mxu0 }
 0x16a   :  { %v514_v3 = vadd.f32 %v513_v58, %v485_v62  ;;  %v441_v4 = vadd.f32 %v440_v61, %v2428_v2  ;;  %v487_v5 = vmul.f32 %v2428_v2, %v2428_v2  ;;  %v2433_v6 = vpop.f32.mrb[7].mxu0 }
 0x16b   :  { %v535_v7 = vadd.f32 %v534_v59, %v486_v1  ;;  %v462_v8 = vadd.f32 %v461_v0, %v2433_v6  ;;  %v488_v9 = vmul.f32 %v2433_v6, %v2433_v6 }
 0x16c   :  { %v515_v10 = vadd.f32 %v514_v3, %v487_v5 }
 0x16d   :  { %v536_v11 = vadd.f32 %v535_v7, %v488_v9 }
 0x16f   :  { %v2438_v12 = vpop.f32.mrb[8].mxu0 }
 0x170   :  { %v442_v13 = vadd.f32 %v441_v4, %v2438_v12  ;;  %v489_v14 = vmul.f32 %v2438_v12, %v2438_v12  ;;  %v2443_v15 = vpop.f32.mrb[9].mxu0 }
 0x171   :  { %v463_v16 = vadd.f32 %v462_v8, %v2443_v15  ;;  %v490_v17 = vmul.f32 %v2443_v15, %v2443_v15  ;;  %v2448_v18 = vpop.f32.mrb[10].mxu0 }
 0x172   :  { %v516_v19 = vadd.f32 %v515_v10, %v489_v14  ;;  %v443_v20 = vadd.f32 %v442_v13, %v2448_v18  ;;  %v491_v21 = vmul.f32 %v2448_v18, %v2448_v18  ;;  %v2453_v22 = vpop.f32.mrb[11].mxu0 }
 0x173   :  { %v537_v23 = vadd.f32 %v536_v11, %v490_v17  ;;  %v464_v24 = vadd.f32 %v463_v16, %v2453_v22  ;;  %v492_v25 = vmul.f32 %v2453_v22, %v2453_v22 }
 0x174   :  { %v517_v26 = vadd.f32 %v516_v19, %v491_v21 }
 0x175   :  { %v538_v27 = vadd.f32 %v537_v23, %v492_v25 }
 0x177   :  { %v2458_v28 = vpop.f32.mrb[12].mxu0 }
 0x178   :  { %v444_v29 = vadd.f32 %v443_v20, %v2458_v28  ;;  %v493_v30 = vmul.f32 %v2458_v28, %v2458_v28  ;;  %v2463_v31 = vpop.f32.mrb[13].mxu0 }
 0x179   :  { %v465_v32 = vadd.f32 %v464_v24, %v2463_v31  ;;  %v494_v33 = vmul.f32 %v2463_v31, %v2463_v31  ;;  %v2468_v34 = vpop.f32.mrb[14].mxu0 }
 0x17a   :  { %v518_v35 = vadd.f32 %v517_v26, %v493_v30  ;;  %v445_v36 = vadd.f32 %v444_v29, %v2468_v34  ;;  %v495_v37 = vmul.f32 %v2468_v34, %v2468_v34  ;;  %v2473_v38 = vpop.f32.mrb[15].mxu0 }
 0x17b   :  { %v539_v39 = vadd.f32 %v538_v27, %v494_v33  ;;  %v466_v40 = vadd.f32 %v465_v32, %v2473_v38  ;;  %v496_v41 = vmul.f32 %v2473_v38, %v2473_v38 }
 0x17c   :  { %v519_v42 = vadd.f32 %v518_v35, %v495_v37 }
 0x17d   :  { %v540_v43 = vadd.f32 %v539_v39, %v496_v41 }
 0x17f   :  { %v2478_v44 = vpop.f32.mrb[16].mxu0 }
 0x180   :  { %v446_v45 = vadd.f32 %v445_v36, %v2478_v44  ;;  %v497_v46 = vmul.f32 %v2478_v44, %v2478_v44  ;;  %v2483_v47 = vpop.f32.mrb[17].mxu0 }
 0x181   :  { %v467_v51 = vadd.f32 %v466_v40, %v2483_v47  ;;  %v498_v52 = vmul.f32 %v2483_v47, %v2483_v47  ;;  %v2488_v53 = vpop.f32.mrb[18].mxu0 }
 0x182   :  { %v520_v55 = vadd.f32 %v519_v42, %v497_v46  ;;  %v447_v56 = vadd.f32 %v446_v45, %v2488_v53  ;;  %v499_v57 = vmul.f32 %v2488_v53, %v2488_v53  ;;  %v2493_v58 = vpop.f32.mrb[19].mxu0 }
 0x183   :  { %v541_v59 = vadd.f32 %v540_v43, %v498_v52  ;;  %v468_v61 = vadd.f32 %v467_v51, %v2493_v58  ;;  %v500_v62 = vmul.f32 %v2493_v58, %v2493_v58 }
 0x184   :  { %v521_v0 = vadd.f32 %v520_v55, %v499_v57 }
 0x185   :  { %v542_v1 = vadd.f32 %v541_v59, %v500_v62 }
 0x187   :  { %v2498_v3 = vpop.f32.mrb[20].mxu0 }
 0x188   :  { %v448_v4 = vadd.f32 %v447_v56, %v2498_v3  ;;  %v501_v5 = vmul.f32 %v2498_v3, %v2498_v3  ;;  %v2503_v7 = vpop.f32.mrb[21].mxu0 }
 0x189   :  { %v469_v8 = vadd.f32 %v468_v61, %v2503_v7  ;;  %v502_v9 = vmul.f32 %v2503_v7, %v2503_v7  ;;  %v2508_v10 = vpop.f32.mrb[22].mxu0 }
 0x18a   :  { %v522_v11 = vadd.f32 %v521_v0, %v501_v5  ;;  %v449_v13 = vadd.f32 %v448_v4, %v2508_v10  ;;  %v503_v14 = vmul.f32 %v2508_v10, %v2508_v10  ;;  %v2513_v16 = vpop.f32.mrb[23].mxu0 }
 0x18b   :  { %v543_v17 = vadd.f32 %v542_v1, %v502_v9  ;;  %v470_v19 = vadd.f32 %v469_v8, %v2513_v16  ;;  %v504_v20 = vmul.f32 %v2513_v16, %v2513_v16 }
 0x18c   :  { %v523_v21 = vadd.f32 %v522_v11, %v503_v14 }
 0x18d   :  { %v544_v23 = vadd.f32 %v543_v17, %v504_v20 }
 0x18f   :  { %v2518_v24 = vpop.f32.mrb[24].mxu0 }
 0x190   :  { %v450_v25 = vadd.f32 %v449_v13, %v2518_v24  ;;  %v505_v26 = vmul.f32 %v2518_v24, %v2518_v24  ;;  %v2523_v27 = vpop.f32.mrb[25].mxu0 }
 0x191   :  { %v471_v29 = vadd.f32 %v470_v19, %v2523_v27  ;;  %v506_v30 = vmul.f32 %v2523_v27, %v2523_v27  ;;  %v2528_v32 = vpop.f32.mrb[26].mxu0 }
 0x192   :  { %v524_v33 = vadd.f32 %v523_v21, %v505_v26  ;;  %v451_v35 = vadd.f32 %v450_v25, %v2528_v32  ;;  %v507_v36 = vmul.f32 %v2528_v32, %v2528_v32  ;;  %v2533_v37 = vpop.f32.mrb[27].mxu0 }
 0x193   :  { %v545_v39 = vadd.f32 %v544_v23, %v506_v30  ;;  %v472_v40 = vadd.f32 %v471_v29, %v2533_v37  ;;  %v508_v41 = vmul.f32 %v2533_v37, %v2533_v37 }
 0x194   :  { %v525_v42 = vadd.f32 %v524_v33, %v507_v36 }
 0x195   :  { %v546_v43 = vadd.f32 %v545_v39, %v508_v41 }
 0x197   :  { %v2538_v45 = vpop.f32.mrb[28].mxu0 }
 0x198   :  { %v452_v46 = vadd.f32 %v451_v35, %v2538_v45  ;;  %v509_v51 = vmul.f32 %v2538_v45, %v2538_v45  ;;  %v2543_v52 = vpop.f32.mrb[29].mxu0 }
 0x199   :  { %v473_v55 = vadd.f32 %v472_v40, %v2543_v52  ;;  %v510_v56 = vmul.f32 %v2543_v52, %v2543_v52  ;;  %v2548_v57 = vpop.f32.mrb[30].mxu0 }
 0x19a   :  { %v526_v59 = vadd.f32 %v525_v42, %v509_v51  ;;  %v453_v61 = vadd.f32 %v452_v46, %v2548_v57  ;;  %v511_v62 = vmul.f32 %v2548_v57, %v2548_v57  ;;  %v2553_v0 = vpop.f32.mrb[31].mxu0 }
 0x19b   :  { %v547_v1 = vadd.f32 %v546_v43, %v510_v56  ;;  %v474_v4 = vadd.f32 %v473_v55, %v2553_v0  ;;  %v512_v5 = vmul.f32 %v2553_v0, %v2553_v0 }
 0x19c   :  { %v454_v8 = vrot.slane %v453_v61, 4  ;;  %v527_v9 = vadd.f32 %v526_v59, %v511_v62 }
 0x19d   :  { %v475_v11 = vrot.slane %v474_v4, 4  ;;  %v548_v13 = vadd.f32 %v547_v1, %v512_v5 }
 0x19e   :  { %v455_v14 = vadd.f32 %v454_v8, %v453_v61  ;;  %v528_v17 = vrot.slane %v527_v9, 4 }
 0x19f   :  { %v476_v19 = vadd.f32 %v475_v11, %v474_v4  ;;  %v549_v20 = vrot.slane %v548_v13, 4 }
 0x1a0   :  { %v456_v21 = vrot.slane %v455_v14, 2  ;;  %v529_v23 = vadd.f32 %v528_v17, %v527_v9 }
 0x1a1   :  { %v477_v25 = vrot.slane %v476_v19, 2  ;;  %v550_v26 = vadd.f32 %v549_v20, %v548_v13 }
 0x1a2   :  { %v457_v29 = vadd.f32 %v456_v21, %v455_v14  ;;  %v530_v30 = vrot.slane %v529_v23, 2  ;;  %v575_v21 = vlaneseq }
 0x1a3   :  { %v478_v33 = vadd.f32 %v477_v25, %v476_v19  ;;  %v551_v35 = vrot.slane %v550_v26, 2  ;;  %v2295_v19 = vmov 1983009808  }
 0x1a4   :  { %v458_v36 = vrot.slane %v457_v29, 1  ;;  %v531_v39 = vadd.f32 %v530_v30, %v529_v23  ;;  %v573_v20 = vunpack.c.l.s4 %v2295_v19  ;;  %v2558_v25 = vshrl.u32 %v575_v21, 7 }
 0x1a5   :  { %v479_v40 = vrot.slane %v478_v33, 1  ;;  %v552_v41 = vadd.f32 %v551_v35, %v550_v26  ;;  %v83_v35 = vld [vmem:[%s3161_s2] sm:$0xf] }
 0x1a6   :  { %v459_v42 = vadd.f32 %v458_v36, %v457_v29  ;;  %v532_v43 = vrot.slane %v531_v39, 1  ;;  %v574_v23 = vunpack.c.0.s8 %v573_v20 }
 0x1a7   :  { %v480_v46 = vadd.f32 %v479_v40, %v478_v33  ;;  %v553_v51 = vrot.slane %v552_v41, 1  ;;  %v588_v40 = vsub.s32 2, %v2558_v25 }
 0x1a8   :  { %v533_v55 = vadd.f32 %v532_v43, %v531_v39  ;;  %v555_v56 = vmul.f32 0.0078125, %v459_v42  ;;  %v2561_v29 = vsub.s32 %v574_v23, %v2558_v25  ;;  %v2568_v39 = vsub.s32 0, %v2558_v25 }
 0x1a9   :  { %v554_v59 = vadd.f32 %v553_v51, %v552_v41  ;;  %v556_v61 = vmul.f32 0.0078125, %v480_v46 }
 0x1aa   :  { %v557_v62 = vmul.f32 0.0078125, %v533_v55  ;;  %v559_v1 = vmul.f32 %v555_v56, %v555_v56 }
 0x1ab   :  { %v558_v4 = vmul.f32 0.0078125, %v554_v59  ;;  %v560_v5 = vmul.f32 %v556_v61, %v556_v61 }
 0x1ac   :  { %v561_v8 = vsub.f32 %v557_v62, %v559_v1  ;;  %v2577_v62 = vsub.s32 1, %v2558_v25  ;;  %v3167_v1 = vsub.s32 3, %v2558_v25 }
 0x1ad   :  { %v562_v9 = vsub.f32 %v558_v4, %v560_v5 }
 0x1ae   :  { %v563_v11 = vmax.f32 %v561_v8, 0.0 }
 0x1af   :  { %v564_v13 = vmax.f32 %v562_v9, 0.0 }
 0x1b0   :  { %v565_v14 = vadd.f32 1e-05, %v563_v11 }
 0x1b1   :  { %v566_v17 = vadd.f32 1e-05, %v564_v13 }
 0x1b2   :  { %2125 = vrsqrt.f32 %v565_v14 }
 0x1b3   :  { %2127 = vrsqrt.f32 %v566_v17 }
 0x1bc   :  { %v2126_v26 = vpop.eup %2125 }
 0x1bd   :  { %v2128_v30 = vpop.eup %2127 }
 0x1be   :  { %v571_v33 = vcombine.low %v2126_v26, %v2128_v30 }
 0x1c0   :  { %v578_v36 = vrot.slane %v571_v33, %v2561_v29 }
 0x1c2   :  { %v580_v41 = vmul.f32 %v578_v36, %v83_v35 }
 0x1c4   :  { %v585_v42 = vrot.slane %v580_v41, %v2568_v39  ;;  %v589_v43 = vrot.slane %v580_v41, %v588_v40 }
 0x1c6   :  { %v592_v46 = vmul.f32 %v585_v42, %v555_v56  ;;  %v593_v51 = vmul.f32 %v589_v43, %v556_v61  ;;  %v610_v55 = vrot.slane %v585_v42, %v2568_v39  ;;  %v614_v59 = vrot.slane %v589_v43, %v2568_v39 }
 0x1c8   :  { %v596_v4 = vcombine.low %v592_v46, %v593_v51  ;;  %v646_v5 = vmul.f32 %v614_v59, %v2553_v0  ;;  %v616_v8 = vmul.f32 %v614_v59, %v2400_v49  ;;  %v618_v9 = vmul.f32 %v614_v59, %v2410_v54 }
 0x1c9   :  { %v615_v11 = vmul.f32 %v610_v55, %v2398_v48  ;;  %v617_v56 = vmul.f32 %v610_v55, %v2402_v50  ;;  %v620_v61 = vmul.f32 %v614_v59, %v2423_v63  ;;  %v622_v13 = vmul.f32 %v614_v59, %v2433_v6 }
 0x1ca   :  { %v603_v14 = vrot.slane %v596_v4, %v2561_v29  ;;  %v619_v17 = vmul.f32 %v610_v55, %v2418_v60  ;;  %v621_v19 = vmul.f32 %v610_v55, %v2428_v2  ;;  %v624_v0 = vmul.f32 %v614_v59, %v2443_v15 }
 0x1cb   :  { %v626_v49 = vmul.f32 %v614_v59, %v2453_v22  ;;  %v623_v54 = vmul.f32 %v610_v55, %v2438_v12  ;;  %v625_v48 = vmul.f32 %v610_v55, %v2448_v18  ;;  %v628_v50 = vmul.f32 %v614_v59, %v2463_v31 }
 0x1cc   :  { %v604_v20 = vrot.slane %v603_v14, 7  ;;  %v630_v63 = vmul.f32 %v614_v59, %v2473_v38  ;;  %v627_v6 = vmul.f32 %v610_v55, %v2458_v28  ;;  %v629_v21 = vmul.f32 %v610_v55, %v2468_v34 }
 0x1cd   :  { %v632_v60 = vmul.f32 %v614_v59, %v2483_v47  ;;  %v634_v2 = vmul.f32 %v614_v59, %v2493_v58  ;;  %v2601_v15 = vmul.f32 %v610_v55, %v2478_v44  ;;  %v2604_v12 = vmul.f32 %v610_v55, %v2488_v53 }
 0x1ce   :  { %v606_v18 = vsub.f32 %v83_v35, %v604_v20  ;;  %v2607_v22 = vmul.f32 %v614_v59, %v2503_v7  ;;  %v2610_v31 = vmul.f32 %v614_v59, %v2513_v16  ;;  %v2613_v28 = vmul.f32 %v610_v55, %v2498_v3 }
 0x1cf   :  { %v2616_v34 = vmul.f32 %v610_v55, %v2508_v10  ;;  %v2619_v38 = vmul.f32 %v614_v59, %v2523_v27  ;;  %v2622_v44 = vmul.f32 %v614_v59, %v2533_v37  ;;  %v2625_v47 = vmul.f32 %v610_v55, %v2518_v24 }
 0x1d0   :  { %v651_v53 = vrot.slane %v606_v18, %v2577_v62  ;;  %v655_v58 = vrot.slane %v606_v18, %v3167_v1  ;;  %v2631_v3 = vmul.f32 %v610_v55, %v2528_v32  ;;  %v2634_v7 = vmul.f32 %v614_v59, %v2543_v52 }
 0x1d1   :  { %v2637_v10 = vmul.f32 %v610_v55, %v2538_v45  ;;  %v2640_v16 = vmul.f32 %v610_v55, %v2548_v57 }
 0x1d2   :  { %v2643_v24 = vrot.slane %v651_v53, %v2577_v62  ;;  %v2646_v27 = vrot.slane %v655_v58, %v2577_v62 }
 0x1d4   :  { %v2649_v37 = vadd.f32 %v2646_v27, %v646_v5  ;;  %v667_v32 = vadd.f32 %v2646_v27, %v616_v8  ;;  %v669_v52 = vadd.f32 %v2646_v27, %v618_v9  ;;  %v666_v23 = vadd.f32 %v2643_v24, %v615_v11 }
 0x1d5   :  { %v668_v45 = vadd.f32 %v2643_v24, %v617_v56  ;;  %v671_v57 = vadd.f32 %v2646_v27, %v620_v61  ;;  %v673_v26 = vadd.f32 %v2646_v27, %v622_v13  ;;  %v670_v30 = vadd.f32 %v2643_v24, %v619_v17 }
 0x1d6   :  { %v699_v33 = vmax.f32 %v667_v32, 0.0  ;;  %v701_v35 = vmax.f32 %v669_v52, 0.0  ;;  %v698_v36 = vmax.f32 %v666_v23, 0.0  ;;  %v672_v41 = vadd.f32 %v2643_v24, %v621_v19 }
 0x1d7   :  { %v700_v42 = vmax.f32 %v668_v45, 0.0  ;;  %v703_v43 = vmax.f32 %v671_v57, 0.0  ;;  %v705_v46 = vmax.f32 %v673_v26, 0.0  ;;  %v702_v51 = vmax.f32 %v670_v30, 0.0 }
 0x1d8   :  { %v731_v55 = vpack.c.bf16 %v701_v35, %v699_v33  ;;  %v704_v59 = vmax.f32 %v672_v41, 0.0  ;;  %v675_v4 = vadd.f32 %v2646_v27, %v624_v0  ;;  %v677_v5 = vadd.f32 %v2646_v27, %v626_v49 }
 0x1d9   :  { %v730_v8 = vpack.c.bf16 %v700_v42, %v698_v36  ;;  %v733_v9 = vpack.c.bf16 %v705_v46, %v703_v43  ;;  %v674_v11 = vadd.f32 %v2643_v24, %v623_v54  ;;  %v676_v56 = vadd.f32 %v2643_v24, %v625_v48 }
 0x1da   :  { %970 = vmatprep.mubr.bf16.mxu1 %v731_v55  ;;  %v732_v61 = vpack.c.bf16 %v704_v59, %v702_v51  ;;  %v707_v13 = vmax.f32 %v675_v4, 0.0  ;;  %v709_v14 = vmax.f32 %v677_v5, 0.0  ;;  %v679_v17 = vadd.f32 %v2646_v27, %v628_v50 }
 0x1db   :  { %971 = vmatmul.mubr.bf16.vlgmr.msra.gmra.mrb[0].mxu1 %v730_v8  ;;  %v706_v19 = vmax.f32 %v674_v11, 0.0  ;;  %v708_v20 = vmax.f32 %v676_v56, 0.0  ;;  %v681_v18 = vadd.f32 %v2646_v27, %v630_v63  ;;  %v678_v0 = vadd.f32 %v2643_v24, %v627_v6 }
 0x1dc   :  { %980 = vmatprep.mubr.bf16.mxu1 %v733_v9  ;;  %v735_v49 = vpack.c.bf16 %v709_v14, %v707_v13  ;;  %v711_v53 = vmax.f32 %v679_v17, 0.0  ;;  %v680_v54 = vadd.f32 %v2643_v24, %v629_v21  ;;  %v683_v48 = vadd.f32 %v2646_v27, %v632_v60 }
 0x1dd   :  { %v734_v58 = vpack.c.bf16 %v708_v20, %v706_v19  ;;  %v713_v32 = vmax.f32 %v681_v18, 0.0  ;;  %v710_v52 = vmax.f32 %v678_v0, 0.0  ;;  %v685_v23 = vadd.f32 %v2646_v27, %v634_v2  ;;  %v2115_v19 = vld [vmem:[#allocation8 + $0x58] sm:$0xff]   ;;  %v2117_v18 = vld [vmem:[#allocation8 + $0x60] sm:$0xff]  }
 0x1de   :  { %v712_v50 = vmax.f32 %v680_v54, 0.0  ;;  %v715_v45 = vmax.f32 %v683_v48, 0.0  ;;  %v682_v57 = vadd.f32 %v2643_v24, %v2601_v15  ;;  %v684_v63 = vadd.f32 %v2643_v24, %v2604_v12  ;;  %v2116_v20 = vld [vmem:[#allocation8 + $0x18] sm:$0xff]   ;;  %v2118_v0 = vld [vmem:[#allocation8 + $0x20] sm:$0xff]   ;;  %v2121_v48 = vld [vmem:[#allocation8 + $0x70] sm:$0xff]  }
 0x1df   :  { %v737_v6 = vpack.c.bf16 %v713_v32, %v711_v53  ;;  %v717_v26 = vmax.f32 %v685_v23, 0.0  ;;  %v687_v21 = vadd.f32 %v2646_v27, %v2607_v22  ;;  %v689_v60 = vadd.f32 %v2646_v27, %v2610_v31  ;;  %v2120_v53 = vld [vmem:[#allocation8 + $0x28] sm:$0xff]  }
 0x1e0   :  { %v736_v30 = vpack.c.bf16 %v712_v50, %v710_v52  ;;  %v714_v33 = vmax.f32 %v682_v57, 0.0  ;;  %v716_v35 = vmax.f32 %v684_v63, 0.0  ;;  %v686_v2 = vadd.f32 %v2643_v24, %v2613_v28  ;;  %v2122_v57 = vld [vmem:[#allocation8 + $0x30] sm:$0xff]  }
 0x1e1   :  { %v739_v36 = vpack.c.bf16 %v717_v26, %v715_v45  ;;  %v719_v41 = vmax.f32 %v687_v21, 0.0  ;;  %v721_v15 = vmax.f32 %v689_v60, 0.0  ;;  %v688_v12 = vadd.f32 %v2643_v24, %v2616_v34  ;;  %v2123_v21 = vld [vmem:[#allocation8 + $0x78] sm:$0xff]  }
 0x1e2   :  { %v738_v42 = vpack.c.bf16 %v716_v35, %v714_v33  ;;  %v718_v43 = vmax.f32 %v686_v2, 0.0  ;;  %v691_v22 = vadd.f32 %v2646_v27, %v2619_v38  ;;  %v693_v31 = vadd.f32 %v2646_v27, %v2622_v44  ;;  %v2124_v33 = vld [vmem:[#allocation8 + $0x38] sm:$0xff]  }
 0x1e3   :  { %981 = vmatmul.mubr.bf16.gmra.mrb[4].mxu1 %v732_v61  ;;  %v741_v46 = vpack.c.bf16 %v721_v15, %v719_v41  ;;  %v720_v51 = vmax.f32 %v688_v12, 0.0  ;;  %v690_v28 = vadd.f32 %v2643_v24, %v2625_v47  ;;  %v692_v55 = vadd.f32 %v2643_v24, %v2631_v3 }
 0x1e4   :  { %990 = vmatprep.mubr.bf16.mxu1 %v735_v49  ;;  %v723_v59 = vmax.f32 %v691_v22, 0.0  ;;  %v725_v34 = vmax.f32 %v693_v31, 0.0  ;;  %v695_v4 = vadd.f32 %v2646_v27, %v2634_v7  ;;  %v729_v38 = vmax.f32 %v2649_v37, 0.0  ;;  %v2109_v7 = vld [vmem:[#allocation8 + $0x40] sm:$0xff]   ;;  %v2113_v27 = vld [vmem:[#allocation8 + $0x50] sm:$0xff]   ;;  %v2119_v49 = vld [vmem:[#allocation8 + $0x68] sm:$0xff]  }
 0x1e5   :  { %v740_v5 = vpack.c.bf16 %v720_v51, %v718_v43  ;;  %v722_v8 = vmax.f32 %v690_v28, 0.0  ;;  %v724_v44 = vmax.f32 %v692_v55, 0.0  ;;  %v694_v9 = vadd.f32 %v2643_v24, %v2637_v10  ;;  %v2110_v10 = vld [vmem:[#allocation8] sm:$0xff]   ;;  %1921 = vmatprep.subr.bf16.mxu0 %v2109_v7  ;;  %1985 = vmatprep.subr.bf16.mxu1 %v2109_v7  ;;  %v2114_v37 = vld [vmem:[#allocation8 + $0x10] sm:$0xff]  }
 0x1e6   :  { %v743_v11 = vpack.c.bf16 %v725_v34, %v723_v59  ;;  %v727_v56 = vmax.f32 %v695_v4, 0.0  ;;  %v696_v47 = vadd.f32 %v2643_v24, %v2640_v16  ;;  %1922 = vmatpush3.bf16.msra.mxu0 %v2110_v10  ;;  %1993 = vmatpush3.bf16.msra.mxu1 %v2110_v10  ;;  %v2111_v16 = vld [vmem:[#allocation8 + $0x48] sm:$0xff]  }
 0x1e7   :  { %v742_v3 = vpack.c.bf16 %v724_v44, %v722_v8  ;;  %v726_v61 = vmax.f32 %v694_v9, 0.0  ;;  %v2112_v24 = vld [vmem:[#allocation8 + $0x8] sm:$0xff]   ;;  %1923 = vmatprep.subr.bf16.mxu0 %v2111_v16  ;;  %1986 = vmatprep.subr.bf16.mxu1 %v2111_v16 }
 0x1e8   :  { %v745_v13 = vpack.c.bf16 %v729_v38, %v727_v56  ;;  %v728_v14 = vmax.f32 %v696_v47, 0.0 }
 0x1ea   :  { %v744_v17 = vpack.c.bf16 %v728_v14, %v726_v61  ;;  %1924 = vmatpush3.bf16.msra.mxu0 %v2112_v24  ;;  %1994 = vmatpush3.bf16.msra.mxu1 %v2112_v24 }
 0x1eb   :  { %991 = vmatmul.mubr.bf16.gmra.mrb[8].mxu1 %v734_v58  ;;  %1925 = vmatprep.subr.bf16.mxu0 %v2113_v27 }
 0x1ec   :  { %1000 = vmatprep.mubr.bf16.mxu1 %v737_v6  ;;  %1987 = vmatprep.subr.bf16.mxu1 %v2113_v27 }
 0x1ee   :  { %1926 = vmatpush3.bf16.msra.mxu0 %v2114_v37  ;;  %1995 = vmatpush3.bf16.msra.mxu1 %v2114_v37 }
 0x1ef   :  { %1927 = vmatprep.subr.bf16.mxu0 %v2115_v19  ;;  %1988 = vmatprep.subr.bf16.mxu1 %v2115_v19 }
 0x1f2   :  { %1928 = vmatpush3.bf16.msra.mxu0 %v2116_v20  ;;  %1996 = vmatpush3.bf16.msra.mxu1 %v2116_v20 }
 0x1f3   :  { %1001 = vmatmul.mubr.bf16.gmra.mrb[12].mxu1 %v736_v30  ;;  %1929 = vmatprep.subr.bf16.mxu0 %v2117_v18 }
 0x1f4   :  { %1010 = vmatprep.mubr.bf16.mxu1 %v739_v36  ;;  %1989 = vmatprep.subr.bf16.mxu1 %v2117_v18 }
 0x1f6   :  { %1930 = vmatpush3.bf16.msra.mxu0 %v2118_v0  ;;  %1997 = vmatpush3.bf16.msra.mxu1 %v2118_v0 }
 0x1f7   :  { %1931 = vmatprep.subr.bf16.mxu0 %v2119_v49  ;;  %1990 = vmatprep.subr.bf16.mxu1 %v2119_v49 }
 0x1fa   :  { %1932 = vmatpush3.bf16.msra.mxu0 %v2120_v53  ;;  %1998 = vmatpush3.bf16.msra.mxu1 %v2120_v53 }
 0x1fb   :  { %1011 = vmatmul.mubr.bf16.gmra.mrb[16].mxu1 %v738_v42  ;;  %1933 = vmatprep.subr.bf16.mxu0 %v2121_v48 }
 0x1fc   :  { %1020 = vmatprep.mubr.bf16.mxu1 %v741_v46  ;;  %1991 = vmatprep.subr.bf16.mxu1 %v2121_v48 }
 0x1fe   :  { %1934 = vmatpush3.bf16.msra.mxu0 %v2122_v57  ;;  %1999 = vmatpush3.bf16.msra.mxu1 %v2122_v57 }
 0x1ff   :  { %1935 = vmatprep.subr.bf16.mxu0 %v2123_v21  ;;  %1992 = vmatprep.subr.bf16.mxu1 %v2123_v21 }
 0x202   :  { %1936 = vmatpush3.bf16.msra.mxu0 %v2124_v33  ;;  %2000 = vmatpush3.bf16.msra.mxu1 %v2124_v33 }
 0x203   :  { %1021 = vmatmul.mubr.bf16.gmra.mrb[20].mxu1 %v740_v5 }
 0x204   :  { %1030 = vmatprep.mubr.bf16.mxu1 %v743_v11 }
 0x20b   :  { %1031 = vmatmul.mubr.bf16.gmra.mrb[24].mxu1 %v742_v3 }
 0x20c   :  { %1040 = vmatprep.mubr.bf16.mxu1 %v745_v13 }
 0x213   :  { %1041 = vmatmul.mubr.bf16.gmra.mrb[28].mxu1 %v744_v17 }
 0x2ae   :  { %v2696_v54 = vpop.f32.mrb[0].mxu1 }
 0x2af   :  { %v2698_v58 = vpop.f32.mrb[1].mxu1  ;;  %v1093_v52 = vmul.f32 %v2696_v54, %v2696_v54 }
 0x2b0   :  { %v2700_v32 = vpop.f32.mrb[2].mxu1  ;;  %v1094_v63 = vmul.f32 %v2698_v58, %v2698_v58 }
 0x2b1   :  { %v1051_v23 = vadd.f32 %v2700_v32, %v2696_v54  ;;  %v1095_v50 = vmul.f32 %v2700_v32, %v2700_v32  ;;  %v2708_v45 = vpop.f32.mrb[3].mxu1 }
 0x2b2   :  { %v1072_v6 = vadd.f32 %v2708_v45, %v2698_v58  ;;  %v1096_v26 = vmul.f32 %v2708_v45, %v2708_v45 }
 0x2b3   :  { %v1125_v60 = vadd.f32 %v1095_v50, %v1093_v52 }
 0x2b4   :  { %v1146_v30 = vadd.f32 %v1096_v26, %v1094_v63 }
 0x2b6   :  { %v2716_v35 = vpop.f32.mrb[4].mxu1 }
 0x2b7   :  { %v1052_v2 = vadd.f32 %v1051_v23, %v2716_v35  ;;  %v1097_v36 = vmul.f32 %v2716_v35, %v2716_v35  ;;  %v2721_v41 = vpop.f32.mrb[5].mxu1 }
 0x2b8   :  { %v1073_v15 = vadd.f32 %v1072_v6, %v2721_v41  ;;  %v1098_v12 = vmul.f32 %v2721_v41, %v2721_v41  ;;  %v2726_v42 = vpop.f32.mrb[6].mxu1 }
 0x2b9   :  { %v1126_v43 = vadd.f32 %v1125_v60, %v1097_v36  ;;  %v1053_v22 = vadd.f32 %v1052_v2, %v2726_v42  ;;  %v1099_v31 = vmul.f32 %v2726_v42, %v2726_v42  ;;  %v2731_v46 = vpop.f32.mrb[7].mxu1 }
 0x2ba   :  { %v1147_v51 = vadd.f32 %v1146_v30, %v1098_v12  ;;  %v1074_v28 = vadd.f32 %v1073_v15, %v2731_v46  ;;  %v1100_v55 = vmul.f32 %v2731_v46, %v2731_v46 }
 0x2bb   :  { %v1127_v59 = vadd.f32 %v1126_v43, %v1099_v31 }
 0x2bc   :  { %v1148_v34 = vadd.f32 %v1147_v51, %v1100_v55 }
 0x2be   :  { %v2736_v4 = vpop.f32.mrb[8].mxu1 }
 0x2bf   :  { %v1054_v38 = vadd.f32 %v1053_v22, %v2736_v4  ;;  %v1101_v5 = vmul.f32 %v2736_v4, %v2736_v4  ;;  %v2741_v8 = vpop.f32.mrb[9].mxu1 }
 0x2c0   :  { %v1075_v44 = vadd.f32 %v1074_v28, %v2741_v8  ;;  %v1102_v9 = vmul.f32 %v2741_v8, %v2741_v8  ;;  %v2746_v11 = vpop.f32.mrb[10].mxu1 }
 0x2c1   :  { %v1128_v56 = vadd.f32 %v1127_v59, %v1101_v5  ;;  %v1055_v47 = vadd.f32 %v1054_v38, %v2746_v11  ;;  %v1103_v3 = vmul.f32 %v2746_v11, %v2746_v11  ;;  %v2751_v61 = vpop.f32.mrb[11].mxu1 }
 0x2c2   :  { %v1149_v13 = vadd.f32 %v1148_v34, %v1102_v9  ;;  %v1076_v14 = vadd.f32 %v1075_v44, %v2751_v61  ;;  %v1104_v17 = vmul.f32 %v2751_v61, %v2751_v61 }
 0x2c3   :  { %v1129_v7 = vadd.f32 %v1128_v56, %v1103_v3 }
 0x2c4   :  { %v1150_v10 = vadd.f32 %v1149_v13, %v1104_v17 }
 0x2c6   :  { %v2756_v16 = vpop.f32.mrb[12].mxu1 }
 0x2c7   :  { %v1056_v24 = vadd.f32 %v1055_v47, %v2756_v16  ;;  %v1105_v27 = vmul.f32 %v2756_v16, %v2756_v16  ;;  %v2761_v37 = vpop.f32.mrb[13].mxu1 }
 0x2c8   :  { %v1077_v19 = vadd.f32 %v1076_v14, %v2761_v37  ;;  %v1106_v20 = vmul.f32 %v2761_v37, %v2761_v37  ;;  %v2766_v18 = vpop.f32.mrb[14].mxu1 }
 0x2c9   :  { %v1130_v0 = vadd.f32 %v1129_v7, %v1105_v27  ;;  %v1057_v49 = vadd.f32 %v1056_v24, %v2766_v18  ;;  %v1107_v53 = vmul.f32 %v2766_v18, %v2766_v18  ;;  %v2771_v48 = vpop.f32.mrb[15].mxu1 }
 0x2ca   :  { %v1151_v52 = vadd.f32 %v1150_v10, %v1106_v20  ;;  %v1078_v23 = vadd.f32 %v1077_v19, %v2771_v48  ;;  %v1108_v50 = vmul.f32 %v2771_v48, %v2771_v48 }
 0x2cb   :  { %v1131_v57 = vadd.f32 %v1130_v0, %v1107_v53 }
 0x2cc   :  { %v1152_v63 = vadd.f32 %v1151_v52, %v1108_v50 }
 0x2ce   :  { %v2776_v6 = vpop.f32.mrb[16].mxu1 }
 0x2cf   :  { %v1058_v26 = vadd.f32 %v1057_v49, %v2776_v6  ;;  %v1109_v21 = vmul.f32 %v2776_v6, %v2776_v6  ;;  %v2781_v60 = vpop.f32.mrb[17].mxu1 }
 0x2d0   :  { %v1079_v30 = vadd.f32 %v1078_v23, %v2781_v60  ;;  %v1110_v33 = vmul.f32 %v2781_v60, %v2781_v60  ;;  %v2786_v2 = vpop.f32.mrb[18].mxu1 }
 0x2d1   :  { %v1132_v36 = vadd.f32 %v1131_v57, %v1109_v21  ;;  %v1059_v15 = vadd.f32 %v1058_v26, %v2786_v2  ;;  %v1111_v12 = vmul.f32 %v2786_v2, %v2786_v2  ;;  %v2791_v43 = vpop.f32.mrb[19].mxu1 }
 0x2d2   :  { %v1153_v22 = vadd.f32 %v1152_v63, %v1110_v33  ;;  %v1080_v31 = vadd.f32 %v1079_v30, %v2791_v43  ;;  %v1112_v51 = vmul.f32 %v2791_v43, %v2791_v43 }
 0x2d3   :  { %v1133_v28 = vadd.f32 %v1132_v36, %v1111_v12 }
 0x2d4   :  { %v1154_v55 = vadd.f32 %v1153_v22, %v1112_v51 }
 0x2d6   :  { %v2796_v59 = vpop.f32.mrb[20].mxu1 }
 0x2d7   :  { %v1060_v34 = vadd.f32 %v1059_v15, %v2796_v59  ;;  %v1113_v38 = vmul.f32 %v2796_v59, %v2796_v59  ;;  %v2801_v5 = vpop.f32.mrb[21].mxu1 }
 0x2d8   :  { %v1081_v44 = vadd.f32 %v1080_v31, %v2801_v5  ;;  %v1114_v9 = vmul.f32 %v2801_v5, %v2801_v5  ;;  %v2806_v56 = vpop.f32.mrb[22].mxu1 }
 0x2d9   :  { %v1134_v47 = vadd.f32 %v1133_v28, %v1113_v38  ;;  %v1061_v3 = vadd.f32 %v1060_v34, %v2806_v56  ;;  %v1115_v13 = vmul.f32 %v2806_v56, %v2806_v56  ;;  %v2811_v14 = vpop.f32.mrb[23].mxu1 }
 0x2da   :  { %v1155_v17 = vadd.f32 %v1154_v55, %v1114_v9  ;;  %v1082_v7 = vadd.f32 %v1081_v44, %v2811_v14  ;;  %v1116_v10 = vmul.f32 %v2811_v14, %v2811_v14 }
 0x2db   :  { %v1135_v24 = vadd.f32 %v1134_v47, %v1115_v13 }
 0x2dc   :  { %v1156_v27 = vadd.f32 %v1155_v17, %v1116_v10 }
 0x2de   :  { %v2816_v19 = vpop.f32.mrb[24].mxu1 }
 0x2df   :  { %v1062_v20 = vadd.f32 %v1061_v3, %v2816_v19  ;;  %v1117_v0 = vmul.f32 %v2816_v19, %v2816_v19  ;;  %v2821_v49 = vpop.f32.mrb[25].mxu1 }
 0x2e0   :  { %v1083_v53 = vadd.f32 %v1082_v7, %v2821_v49  ;;  %v1118_v52 = vmul.f32 %v2821_v49, %v2821_v49  ;;  %v2826_v23 = vpop.f32.mrb[26].mxu1 }
 0x2e1   :  { %v1136_v50 = vadd.f32 %v1135_v24, %v1117_v0  ;;  %v1063_v57 = vadd.f32 %v1062_v20, %v2826_v23  ;;  %v1119_v63 = vmul.f32 %v2826_v23, %v2826_v23  ;;  %v2831_v26 = vpop.f32.mrb[27].mxu1 }
 0x2e2   :  { %v1157_v21 = vadd.f32 %v1156_v27, %v1118_v52  ;;  %v1084_v30 = vadd.f32 %v1083_v53, %v2831_v26  ;;  %v1120_v33 = vmul.f32 %v2831_v26, %v2831_v26 }
 0x2e3   :  { %v1137_v36 = vadd.f32 %v1136_v50, %v1119_v63 }
 0x2e4   :  { %v1158_v15 = vadd.f32 %v1157_v21, %v1120_v33 }
 0x2e6   :  { %v2836_v12 = vpop.f32.mrb[28].mxu1 }
 0x2e7   :  { %v1064_v22 = vadd.f32 %v1063_v57, %v2836_v12  ;;  %v1121_v31 = vmul.f32 %v2836_v12, %v2836_v12  ;;  %v2841_v51 = vpop.f32.mrb[29].mxu1 }
 0x2e8   :  { %v1085_v28 = vadd.f32 %v1084_v30, %v2841_v51  ;;  %v1122_v55 = vmul.f32 %v2841_v51, %v2841_v51  ;;  %v2846_v34 = vpop.f32.mrb[30].mxu1 }
 0x2e9   :  { %v1138_v38 = vadd.f32 %v1137_v36, %v1121_v31  ;;  %v1065_v44 = vadd.f32 %v1064_v22, %v2846_v34  ;;  %v1123_v9 = vmul.f32 %v2846_v34, %v2846_v34  ;;  %v1048_v47 = vpop.f32.mrb[31].mxu1 }
 0x2ea   :  { %v1159_v3 = vadd.f32 %v1158_v15, %v1122_v55  ;;  %v1086_v13 = vadd.f32 %v1085_v28, %v1048_v47  ;;  %v1124_v17 = vmul.f32 %v1048_v47, %v1048_v47 }
 0x2eb   :  { %v1066_v7 = vrot.slane %v1065_v44, 4  ;;  %v1139_v10 = vadd.f32 %v1138_v38, %v1123_v9 }
 0x2ec   :  { %v1087_v24 = vrot.slane %v1086_v13, 4  ;;  %v1160_v27 = vadd.f32 %v1159_v3, %v1124_v17 }
 0x2ed   :  { %v1067_v20 = vadd.f32 %v1066_v7, %v1065_v44  ;;  %v1140_v0 = vrot.slane %v1139_v10, 4 }
 0x2ee   :  { %v1088_v53 = vadd.f32 %v1087_v24, %v1086_v13  ;;  %v1161_v52 = vrot.slane %v1160_v27, 4 }
 0x2ef   :  { %v1068_v50 = vrot.slane %v1067_v20, 2  ;;  %v1141_v57 = vadd.f32 %v1140_v0, %v1139_v10 }
 0x2f0   :  { %v1089_v63 = vrot.slane %v1088_v53, 2  ;;  %v1162_v21 = vadd.f32 %v1161_v52, %v1160_v27 }
 0x2f1   :  { %v1069_v30 = vadd.f32 %v1068_v50, %v1067_v20  ;;  %v1142_v33 = vrot.slane %v1141_v57, 2 }
 0x2f2   :  { %v1090_v36 = vadd.f32 %v1089_v63, %v1088_v53  ;;  %v1163_v22 = vrot.slane %v1162_v21, 2 }
 0x2f3   :  { %v1070_v31 = vrot.slane %v1069_v30, 1  ;;  %v1143_v15 = vadd.f32 %v1142_v33, %v1141_v57 }
 0x2f4   :  { %v1091_v28 = vrot.slane %v1090_v36, 1  ;;  %v1164_v55 = vadd.f32 %v1163_v22, %v1162_v21 }
 0x2f5   :  { %v1071_v1 = vadd.f32 %v1070_v31, %v1069_v30  ;;  %v1144_v38 = vrot.slane %v1143_v15, 1 }
 0x2f6   :  { %v1092_v9 = vadd.f32 %v1091_v28, %v1090_v36  ;;  %v1165_v3 = vrot.slane %v1164_v55, 1 }
 0x2f7   :  { %v1145_v44 = vadd.f32 %v1144_v38, %v1143_v15  ;;  %v1167_v17 = vmul.f32 0.0078125, %v1071_v1  ;;  %v84_v1 = vld [vmem:[%s3163_s4] sm:$0xf] }
 0x2f8   :  { %v1166_v13 = vadd.f32 %v1165_v3, %v1164_v55  ;;  %v1168_v7 = vmul.f32 0.0078125, %v1092_v9 }
 0x2f9   :  { %v1169_v24 = vmul.f32 0.0078125, %v1145_v44  ;;  %v1171_v10 = vmul.f32 %v1167_v17, %v1167_v17 }
 0x2fa   :  { %v1170_v0 = vmul.f32 0.0078125, %v1166_v13  ;;  %v1172_v27 = vmul.f32 %v1168_v7, %v1168_v7 }
 0x2fb   :  { %v1173_v20 = vsub.f32 %v1169_v24, %v1171_v10 }
 0x2fc   :  { %v1174_v52 = vsub.f32 %v1170_v0, %v1172_v27 }
 0x2fd   :  { %v1175_v53 = vmax.f32 %v1173_v20, 0.0 }
 0x2fe   :  { %v1176_v50 = vmax.f32 %v1174_v52, 0.0 }
 0x2ff   :  { %v1177_v63 = vadd.f32 1e-05, %v1175_v53 }
 0x300   :  { %v1178_v57 = vadd.f32 1e-05, %v1176_v50 }
 0x301   :  { %2129 = vrsqrt.f32 %v1177_v63 }
 0x302   :  { %2131 = vrsqrt.f32 %v1178_v57 }
 0x30b   :  { %v2130_v21 = vpop.eup %2129 }
 0x30c   :  { %v2132_v30 = vpop.eup %2131 }
 0x30d   :  { %v1183_v33 = vcombine.low %v2130_v21, %v2132_v30 }
 0x30f   :  { %v1190_v36 = vrot.slane %v1183_v33, %v2561_v29 }
 0x311   :  { %v1192_v22 = vmul.f32 %v1190_v36, %v84_v1 }
 0x313   :  { %v1197_v31 = vrot.slane %v1192_v22, %v2568_v39  ;;  %v1201_v15 = vrot.slane %v1192_v22, %v588_v40 }
 0x315   :  { %v1204_v28 = vmul.f32 %v1197_v31, %v1167_v17  ;;  %v1205_v55 = vmul.f32 %v1201_v15, %v1168_v7  ;;  %v1222_v38 = vrot.slane %v1197_v31, %v2568_v39  ;;  %v1226_v9 = vrot.slane %v1201_v15, %v2568_v39 }
 0x317   :  { %v1208_v3 = vcombine.low %v1204_v28, %v1205_v55  ;;  %v1258_v44 = vmul.f32 %v1226_v9, %v1048_v47  ;;  %v1228_v13 = vmul.f32 %v1226_v9, %v2698_v58  ;;  %v1230_v24 = vmul.f32 %v1226_v9, %v2708_v45 }
 0x318   :  { %v1244_v10 = vmul.f32 %v1226_v9, %v2781_v60  ;;  %v1246_v0 = vmul.f32 %v1226_v9, %v2791_v43  ;;  %v1227_v27 = vmul.f32 %v1222_v38, %v2696_v54  ;;  %v1229_v40 = vmul.f32 %v1222_v38, %v2700_v32 }
 0x319   :  { %v1215_v17 = vrot.slane %v1208_v3, %v2561_v29  ;;  %v1243_v7 = vmul.f32 %v1222_v38, %v2776_v6  ;;  %v1245_v20 = vmul.f32 %v1222_v38, %v2786_v2  ;;  %v1232_v47 = vmul.f32 %v1226_v9, %v2721_v41 }
 0x31a   :  { %v1234_v58 = vmul.f32 %v1226_v9, %v2731_v46  ;;  %v1248_v45 = vmul.f32 %v1226_v9, %v2801_v5  ;;  %v1250_v60 = vmul.f32 %v1226_v9, %v2811_v14  ;;  %v1231_v43 = vmul.f32 %v1222_v38, %v2716_v35 }
 0x31b   :  { %v1216_v52 = vrot.slane %v1215_v17, 7  ;;  %v1233_v54 = vmul.f32 %v1222_v38, %v2726_v42  ;;  %v1247_v32 = vmul.f32 %v1222_v38, %v2796_v59  ;;  %v1249_v29 = vmul.f32 %v1222_v38, %v2806_v56 }
 0x31c   :  { %v1236_v6 = vmul.f32 %v1226_v9, %v2741_v8  ;;  %v1238_v2 = vmul.f32 %v1226_v9, %v2751_v61  ;;  %v2880_v41 = vmul.f32 %v1226_v9, %v2821_v49  ;;  %v2883_v46 = vmul.f32 %v1226_v9, %v2831_v26 }
 0x31d   :  { %v1218_v5 = vsub.f32 %v84_v1, %v1216_v52  ;;  %v2886_v35 = vmul.f32 %v1222_v38, %v2736_v4  ;;  %v2889_v42 = vmul.f32 %v1222_v38, %v2746_v11  ;;  %v2892_v59 = vmul.f32 %v1222_v38, %v2816_v19 }
 0x31e   :  { %v2895_v8 = vmul.f32 %v1222_v38, %v2826_v23  ;;  %v2898_v61 = vmul.f32 %v1226_v9, %v2761_v37  ;;  %v2901_v56 = vmul.f32 %v1226_v9, %v2771_v48  ;;  %v2904_v14 = vmul.f32 %v1226_v9, %v2841_v51 }
 0x31f   :  { %v1263_v4 = vrot.slane %v1218_v5, %v2577_v62  ;;  %v3168_v11 = vsub.s32 3, %v2558_v25  ;;  %v2910_v19 = vmul.f32 %v1222_v38, %v2756_v16  ;;  %v2913_v23 = vmul.f32 %v1222_v38, %v2766_v18 }
 0x320   :  { %v2916_v37 = vmul.f32 %v1222_v38, %v2836_v12  ;;  %v2919_v48 = vmul.f32 %v1222_v38, %v2846_v34 }
 0x321   :  { %v1267_v49 = vrot.slane %v1218_v5, %v3168_v11  ;;  %v2922_v26 = vrot.slane %v1263_v4, %v2577_v62 }
 0x323   :  { %v2925_v51 = vrot.slane %v1267_v49, %v2577_v62  ;;  %v1278_v34 = vadd.f32 %v2922_v26, %v1227_v27  ;;  %v1280_v50 = vadd.f32 %v2922_v26, %v1229_v40  ;;  %v1294_v63 = vadd.f32 %v2922_v26, %v1243_v7 }
 0x324   :  { %v1296_v33 = vadd.f32 %v2922_v26, %v1245_v20  ;;  %v1282_v27 = vadd.f32 %v2922_v26, %v1231_v43  ;;  %v1284_v7 = vadd.f32 %v2922_v26, %v1233_v54  ;;  %v1298_v20 = vadd.f32 %v2922_v26, %v1247_v32 }
 0x325   :  { %v2928_v25 = vadd.f32 %v2925_v51, %v1258_v44  ;;  %v1279_v16 = vadd.f32 %v2925_v51, %v1228_v13  ;;  %v1281_v18 = vadd.f32 %v2925_v51, %v1230_v24  ;;  %v1295_v53 = vadd.f32 %v2925_v51, %v1244_v10 }
 0x326   :  { %v1297_v12 = vadd.f32 %v2925_v51, %v1246_v0  ;;  %v1310_v36 = vmax.f32 %v1278_v34, 0.0  ;;  %v1312_v22 = vmax.f32 %v1280_v50, 0.0  ;;  %v1326_v31 = vmax.f32 %v1294_v63, 0.0 }
 0x327   :  { %v1311_v57 = vmax.f32 %v1279_v16, 0.0  ;;  %v1313_v21 = vmax.f32 %v1281_v18, 0.0  ;;  %v1327_v30 = vmax.f32 %v1295_v53, 0.0  ;;  %v1328_v28 = vmax.f32 %v1296_v33, 0.0 }
 0x328   :  { %v1329_v1 = vmax.f32 %v1297_v12, 0.0  ;;  %v1283_v55 = vadd.f32 %v2925_v51, %v1232_v47  ;;  %v1285_v38 = vadd.f32 %v2925_v51, %v1234_v58  ;;  %v1342_v3 = vpack.c.bf16 %v1312_v22, %v1310_v36 }
 0x329   :  { %v1343_v15 = vpack.c.bf16 %v1313_v21, %v1311_v57  ;;  %v1299_v44 = vadd.f32 %v2925_v51, %v1248_v45  ;;  %v1301_v13 = vadd.f32 %v2925_v51, %v1250_v60  ;;  %v1350_v24 = vpack.c.bf16 %v1328_v28, %v1326_v31 }
 0x32a   :  { %v1351_v9 = vpack.c.bf16 %v1329_v1, %v1327_v30  ;;  %v1315_v10 = vmax.f32 %v1283_v55, 0.0  ;;  %v1317_v0 = vmax.f32 %v1285_v38, 0.0  ;;  %v1314_v58 = vmax.f32 %v1282_v27, 0.0 }
 0x32b   :  { %1518 = vmatprep.mubr.bf16.mxu0 %v1343_v15  ;;  %v1331_v40 = vmax.f32 %v1299_v44, 0.0  ;;  %v1333_v17 = vmax.f32 %v1301_v13, 0.0  ;;  %v1300_v45 = vadd.f32 %v2922_v26, %v1249_v29  ;;  %v1287_v60 = vadd.f32 %v2925_v51, %v1236_v6 }
 0x32c   :  { %1550 = vmatprep.mubr.bf16.mxu1 %v1351_v9  ;;  %1519 = vmatmul.mubr.bf16.vlgmr.msra.gmra.mrb[32].mxu0 %v1342_v3  ;;  %v1345_v47 = vpack.c.bf16 %v1317_v0, %v1315_v10  ;;  %v1316_v5 = vmax.f32 %v1284_v7, 0.0  ;;  %v1330_v4 = vmax.f32 %v1298_v20, 0.0  ;;  %v1289_v43 = vadd.f32 %v2925_v51, %v1238_v2 }
 0x32d   :  { %1551 = vmatmul.mubr.bf16.vlgmr.msra.gmra.mrb[32].mxu1 %v1350_v24  ;;  %v1353_v52 = vpack.c.bf16 %v1333_v17, %v1331_v40  ;;  %v1332_v11 = vmax.f32 %v1300_v45, 0.0  ;;  %v1319_v49 = vmax.f32 %v1287_v60, 0.0  ;;  %v1303_v54 = vadd.f32 %v2925_v51, %v2880_v41 }
 0x32e   :  { %1526 = vmatprep.mubr.bf16.mxu0 %v1345_v47  ;;  %v1305_v32 = vadd.f32 %v2925_v51, %v2883_v46  ;;  %v1344_v16 = vpack.c.bf16 %v1316_v5, %v1314_v58  ;;  %v1321_v18 = vmax.f32 %v1289_v43, 0.0  ;;  %v1286_v29 = vadd.f32 %v2922_v26, %v2886_v35 }
 0x32f   :  { %1558 = vmatprep.mubr.bf16.mxu1 %v1353_v52  ;;  %v1288_v6 = vadd.f32 %v2922_v26, %v2889_v42  ;;  %v1352_v53 = vpack.c.bf16 %v1332_v11, %v1330_v4  ;;  %v1335_v2 = vmax.f32 %v1303_v54, 0.0  ;;  %v1302_v34 = vadd.f32 %v2922_v26, %v2892_v59 }
 0x330   :  { %v1337_v12 = vmax.f32 %v1305_v32, 0.0  ;;  %v1347_v50 = vpack.c.bf16 %v1321_v18, %v1319_v49  ;;  %v1318_v41 = vmax.f32 %v1286_v29, 0.0  ;;  %v1304_v46 = vadd.f32 %v2922_v26, %v2895_v8 }
 0x331   :  { %v1320_v63 = vmax.f32 %v1288_v6, 0.0  ;;  %v1334_v21 = vmax.f32 %v1302_v34, 0.0  ;;  %v1291_v35 = vadd.f32 %v2925_v51, %v2898_v61  ;;  %v1293_v42 = vadd.f32 %v2925_v51, %v2901_v56 }
 0x332   :  { %v1355_v57 = vpack.c.bf16 %v1337_v12, %v1335_v2  ;;  %v1336_v33 = vmax.f32 %v1304_v46, 0.0  ;;  %v1307_v59 = vadd.f32 %v2925_v51, %v2904_v14  ;;  %v1341_v1 = vmax.f32 %v2928_v25, 0.0 }
 0x333   :  { %v1346_v30 = vpack.c.bf16 %v1320_v63, %v1318_v41  ;;  %v1323_v36 = vmax.f32 %v1291_v35, 0.0  ;;  %v1325_v8 = vmax.f32 %v1293_v42, 0.0  ;;  %v1290_v22 = vadd.f32 %v2922_v26, %v2910_v19 }
 0x334   :  { %1527 = vmatmul.mubr.bf16.gmra.mrb[36].mxu0 %v1344_v16  ;;  %v1292_v61 = vadd.f32 %v2922_v26, %v2913_v23  ;;  %v1354_v56 = vpack.c.bf16 %v1336_v33, %v1334_v21  ;;  %v1339_v31 = vmax.f32 %v1307_v59, 0.0  ;;  %v1306_v15 = vadd.f32 %v2922_v26, %v2916_v37 }
 0x335   :  { %1559 = vmatmul.mubr.bf16.gmra.mrb[36].mxu1 %v1352_v53  ;;  %1534 = vmatprep.mubr.bf16.mxu0 %v1347_v50  ;;  %v1308_v14 = vadd.f32 %v2922_v26, %v2919_v48  ;;  %v1349_v51 = vpack.c.bf16 %v1325_v8, %v1323_v36  ;;  %v1322_v25 = vmax.f32 %v1290_v22, 0.0 }
 0x336   :  { %1566 = vmatprep.mubr.bf16.mxu1 %v1355_v57  ;;  %v1324_v28 = vmax.f32 %v1292_v61, 0.0  ;;  %v1357_v55 = vpack.c.bf16 %v1341_v1, %v1339_v31  ;;  %v1338_v38 = vmax.f32 %v1306_v15, 0.0 }
 0x337   :  { %v1340_v9 = vmax.f32 %v1308_v14, 0.0 }
 0x338   :  { %v1348_v3 = vpack.c.bf16 %v1324_v28, %v1322_v25 }
 0x339   :  { %v1356_v19 = vpack.c.bf16 %v1340_v9, %v1338_v38 }
 0x33c   :  { %1535 = vmatmul.mubr.bf16.gmra.mrb[40].mxu0 %v1346_v30 }
 0x33d   :  { %1567 = vmatmul.mubr.bf16.gmra.mrb[40].mxu1 %v1354_v56  ;;  %1542 = vmatprep.mubr.bf16.mxu0 %v1349_v51 }
 0x33e   :  { %1574 = vmatprep.mubr.bf16.mxu1 %v1357_v55 }
 0x344   :  { %1543 = vmatmul.mubr.bf16.gmra.mrb[44].mxu0 %v1348_v3 }
 0x345   :  { %1575 = vmatmul.mubr.bf16.gmra.mrb[44].mxu1 %v1356_v19 }
 0x3ff   :  { %v1937_v23 = vpop.f32.mrb[32].mxu0 }
 0x400   :  { %v1961_v44 = vpop.f32.mrb[32].mxu1  ;;  %v1938_v37 = vpop.f32.mrb[33].mxu0 }
 0x401   :  { %v2975_v13 = vadd.f32 %v1938_v37, %v1937_v23  ;;  %v1962_v48 = vpop.f32.mrb[33].mxu1  ;;  %v1940_v26 = vpop.f32.mrb[34].mxu0 }
 0x402   :  { %v2977_v24 = vadd.f32 %v1962_v48, %v1961_v44  ;;  %v1964_v10 = vpop.f32.mrb[34].mxu1  ;;  %v1941_v0 = vpop.f32.mrb[35].mxu0 }
 0x403   :  { %v2979_v27 = vadd.f32 %v1941_v0, %v1940_v26  ;;  %v1965_v40 = vpop.f32.mrb[35].mxu1  ;;  %v1604_v32 = vmul.f32 %v2975_v13, %v2975_v13 }
 0x404   :  { %v2981_v17 = vadd.f32 %v1965_v40, %v1964_v10  ;;  %v1612_v40 = vmul.f32 %v2977_v24, %v2977_v24 }
 0x405   :  { %v1605_v43 = vmul.f32 %v2979_v27, %v2979_v27  ;;  %v1583_v16 = vadd.f32 %v2979_v27, %v2975_v13 }
 0x407   :  { %v1943_v7 = vpop.f32.mrb[36].mxu0  ;;  %v1620_v29 = vadd.f32 %v1605_v43, %v1604_v32 }
 0x408   :  { %v1967_v20 = vpop.f32.mrb[36].mxu1  ;;  %v1944_v47 = vpop.f32.mrb[37].mxu0 }
 0x409   :  { %v2983_v58 = vadd.f32 %v1944_v47, %v1943_v7  ;;  %v1968_v45 = vpop.f32.mrb[37].mxu1  ;;  %v1946_v60 = vpop.f32.mrb[38].mxu0  ;;  %v1613_v47 = vmul.f32 %v2981_v17, %v2981_v17 }
 0x40a   :  { %v2985_v52 = vadd.f32 %v1968_v45, %v1967_v20  ;;  %v1970_v5 = vpop.f32.mrb[38].mxu1  ;;  %v1947_v4 = vpop.f32.mrb[39].mxu0 }
 0x40b   :  { %v2989_v11 = vadd.f32 %v1947_v4, %v1946_v60  ;;  %v1971_v49 = vpop.f32.mrb[39].mxu1  ;;  %v1606_v18 = vmul.f32 %v2983_v58, %v2983_v58  ;;  %v1584_v6 = vadd.f32 %v2983_v58, %v1583_v16 }
 0x40c   :  { %v2991_v54 = vadd.f32 %v1971_v49, %v1970_v5  ;;  %v1614_v5 = vmul.f32 %v2985_v52, %v2985_v52 }
 0x40d   :  { %v1621_v34 = vadd.f32 %v1620_v29, %v1606_v18  ;;  %v1607_v50 = vmul.f32 %v2989_v11, %v2989_v11  ;;  %v1585_v42 = vadd.f32 %v2989_v11, %v1584_v6 }
 0x40e   :  { %v1615_v49 = vmul.f32 %v2991_v54, %v2991_v54 }
 0x40f   :  { %v1949_v53 = vpop.f32.mrb[40].mxu0  ;;  %v1622_v36 = vadd.f32 %v1621_v34, %v1607_v50 }
 0x410   :  { %v1973_v2 = vpop.f32.mrb[40].mxu1  ;;  %v1950_v12 = vpop.f32.mrb[41].mxu0 }
 0x411   :  { %v3002_v41 = vadd.f32 %v1950_v12, %v1949_v53  ;;  %v1974_v63 = vpop.f32.mrb[41].mxu1  ;;  %v1952_v46 = vpop.f32.mrb[42].mxu0 }
 0x412   :  { %v3004_v57 = vadd.f32 %v1974_v63, %v1973_v2  ;;  %v1976_v21 = vpop.f32.mrb[42].mxu1  ;;  %v1953_v35 = vpop.f32.mrb[43].mxu0 }
 0x413   :  { %v1608_v30 = vmul.f32 %v3002_v41, %v3002_v41  ;;  %v3009_v33 = vadd.f32 %v1953_v35, %v1952_v46  ;;  %v1977_v59 = vpop.f32.mrb[43].mxu1  ;;  %v1586_v8 = vadd.f32 %v3002_v41, %v1585_v42 }
 0x414   :  { %v3011_v1 = vadd.f32 %v1977_v59, %v1976_v21  ;;  %v1616_v18 = vmul.f32 %v3004_v57, %v3004_v57 }
 0x415   :  { %v1623_v22 = vadd.f32 %v1622_v36, %v1608_v30  ;;  %v1609_v61 = vmul.f32 %v3009_v33, %v3009_v33  ;;  %v1587_v14 = vadd.f32 %v3009_v33, %v1586_v8 }
 0x416   :  { %v1617_v53 = vmul.f32 %v3011_v1, %v3011_v1 }
 0x417   :  { %v1955_v56 = vpop.f32.mrb[44].mxu0  ;;  %v1624_v3 = vadd.f32 %v1623_v22, %v1609_v61 }
 0x418   :  { %v1979_v31 = vpop.f32.mrb[44].mxu1  ;;  %v1956_v15 = vpop.f32.mrb[45].mxu0 }
 0x419   :  { %v3017_v51 = vadd.f32 %v1956_v15, %v1955_v56  ;;  %v1980_v25 = vpop.f32.mrb[45].mxu1  ;;  %v1958_v28 = vpop.f32.mrb[46].mxu0 }
 0x41a   :  { %v3019_v55 = vadd.f32 %v1980_v25, %v1979_v31  ;;  %v1982_v38 = vpop.f32.mrb[46].mxu1  ;;  %v1959_v9 = vpop.f32.mrb[47].mxu0 }
 0x41b   :  { %v1588_v19 = vadd.f32 %v3017_v51, %v1587_v14  ;;  %v1610_v23 = vmul.f32 %v3017_v51, %v3017_v51  ;;  %v1960_v44 = vadd.f32 %v1959_v9, %v1958_v28  ;;  %v1983_v37 = vpop.f32.mrb[47].mxu1 }
 0x41c   :  { %v1984_v48 = vadd.f32 %v1983_v37, %v1982_v38  ;;  %v1618_v34 = vmul.f32 %v3019_v55, %v3019_v55 }
 0x41d   :  { %v1625_v26 = vadd.f32 %v1624_v3, %v1610_v23  ;;  %v1589_v10 = vadd.f32 %v1960_v44, %v1588_v19  ;;  %v1611_v0 = vmul.f32 %v1960_v44, %v1960_v44 }
 0x41e   :  { %v1619_v21 = vmul.f32 %v1984_v48, %v1984_v48 }
 0x41f   :  { %v1590_v7 = vadd.f32 %v2977_v24, %v1589_v10  ;;  %v1626_v20 = vadd.f32 %v1625_v26, %v1611_v0  ;;  %v85_v26 = vld [vmem:[%s3165_s6] sm:$0x3]  ;;  %s2296_s6 = smov [#allocation10]  }
 0x420   :  { %s1827_s10 = sshll.u32 %s2296_s6, 4  ;;  %s1828_s10 = int_to_ptr.vmem [resolvable:$true] %s1827_s10 }
 0x421   :  { %v1591_v45 = vadd.f32 %v2981_v17, %v1590_v7  ;;  %v1627_v60 = vadd.f32 %v1626_v20, %v1612_v40  ;;  %s2255_s13 = scalar_lea.vmem %s1828_s10, 2048  ;;  %p2260_p5 = scmp.lt.s32.totalorder %s1828_s10, %s1828_s10 }
 0x422   :  { %p2256_p4 = scmp.ne.s32.totalorder %s1828_s10, %s2255_s13  ;;  %p2261_p6 = scmp.lt.s32.totalorder %s2255_s13, %s2255_s13 }
 0x423   :  { %v1592_v4 = vadd.f32 %v2985_v52, %v1591_v45  ;;  %v1628_v43 = vadd.f32 %v1627_v60, %v1613_v47 }
 0x424   :  { %p2262_p7 = por %p2261_p6, %p2260_p5 }
 0x425   :  { %v1629_v32 = vadd.f32 %v1628_v43, %v1614_v5  ;;  %v1593_v16 = vadd.f32 %v2991_v54, %v1592_v4 }
 0x426   :  { %p2263_p8 = pnand %p2262_p7, %p2256_p4 }
 0x427   :  { %v1594_v29 = vadd.f32 %v3004_v57, %v1593_v16  ;;  %v1630_v6 = vadd.f32 %v1629_v32, %v1615_v49 }
 0x429   :  { %v1595_v2 = vadd.f32 %v3011_v1, %v1594_v29  ;;  %v1631_v12 = vadd.f32 %v1630_v6, %v1616_v18 }
 0x42b   :  { %v1596_v50 = vadd.f32 %v3019_v55, %v1595_v2  ;;  %v1632_v63 = vadd.f32 %v1631_v12, %v1617_v53 }
 0x42d   :  { %v1597_v46 = vadd.f32 %v1984_v48, %v1596_v50  ;;  %v1633_v35 = vadd.f32 %v1632_v63, %v1618_v34 }
 0x42f   :  { %v1598_v42 = vrot.slane %v1597_v46, 4  ;;  %v1634_v30 = vadd.f32 %v1633_v35, %v1619_v21 }
 0x431   :  { %v1599_v59 = vadd.f32 %v1598_v42, %v1597_v46  ;;  %v1635_v36 = vrot.slane %v1634_v30, 4 }
 0x433   :  { %v1600_v8 = vrot.slane %v1599_v59, 2  ;;  %v1636_v22 = vadd.f32 %v1635_v36, %v1634_v30 }
 0x435   :  { %v1601_v61 = vadd.f32 %v1600_v8, %v1599_v59  ;;  %v1637_v56 = vrot.slane %v1636_v22, 2 }
 0x437   :  { %v1602_v31 = vrot.slane %v1601_v61, 1  ;;  %v1638_v15 = vadd.f32 %v1637_v56, %v1636_v22 }
 0x439   :  { %v1603_v14 = vadd.f32 %v1602_v31, %v1601_v61  ;;  %v1639_v25 = vrot.slane %v1638_v15, 1 }
 0x43b   :  { %v1640_v28 = vadd.f32 %v1639_v25, %v1638_v15  ;;  %v1641_v38 = vmul.f32 0.0078125, %v1603_v14 }
 0x43d   :  { %v1642_v9 = vmul.f32 0.0078125, %v1640_v28  ;;  %v1643_v3 = vmul.f32 %v1641_v38, %v1641_v38 }
 0x43f   :  { %v1644_v19 = vsub.f32 %v1642_v9, %v1643_v3 }
 0x441   :  { %v1645_v23 = vmax.f32 %v1644_v19, 0.0 }
 0x443   :  { %v1646_v37 = vadd.f32 1e-05, %v1645_v23 }
 0x445   :  { %2133 = vrsqrt.f32 %v1646_v37 }
 0x44f   :  { %v2134_v10 = vpop.eup %2133 }
 0x450   :  { %v1648_v0 = vmul.f32 %v2134_v10, %v85_v26 }
 0x452   :  { %v1649_v40 = vmul.f32 %v1648_v0, %v1641_v38  ;;  %v1657_v7 = vrot.slane %v1648_v0, %v2568_v39 }
 0x454   :  { %v1651_v20 = vrot.slane %v1649_v40, 7  ;;  %v1673_v47 = vmul.f32 %v1984_v48, %v1657_v7  ;;  %v1663_v45 = vmul.f32 %v3009_v33, %v1657_v7  ;;  %v1665_v5 = vmul.f32 %v1960_v44, %v1657_v7 }
 0x455   :  { %v1664_v4 = vmul.f32 %v3017_v51, %v1657_v7  ;;  %v1660_v43 = vmul.f32 %v2983_v58, %v1657_v7  ;;  %v1658_v49 = vmul.f32 %v2975_v13, %v1657_v7  ;;  %v1661_v16 = vmul.f32 %v2989_v11, %v1657_v7 }
 0x456   :  { %v1653_v60 = vsub.f32 %v85_v26, %v1651_v20  ;;  %v1659_v18 = vmul.f32 %v2979_v27, %v1657_v7  ;;  %v1672_v39 = vmul.f32 %v3019_v55, %v1657_v7  ;;  %v1662_v48 = vmul.f32 %v3002_v41, %v1657_v7 }
 0x457   :  { %v1666_v27 = vmul.f32 %v2977_v24, %v1657_v7  ;;  %v1669_v11 = vmul.f32 %v2991_v54, %v1657_v7  ;;  %v1668_v63 = vmul.f32 %v2985_v52, %v1657_v7  ;;  %v1671_v46 = vmul.f32 %v3011_v1, %v1657_v7 }
 0x458   :  { %v1677_v32 = vrot.slane %v1653_v60, %v2577_v62  ;;  %v1667_v62 = vmul.f32 %v2981_v17, %v1657_v7  ;;  %v1670_v17 = vmul.f32 %v3004_v57, %v1657_v7 }
 0x45a   :  { %v1680_v29 = vadd.f32 %v1677_v32, %v1660_v43  ;;  %v1678_v33 = vadd.f32 %v1677_v32, %v1658_v49  ;;  %v1681_v6 = vadd.f32 %v1677_v32, %v1661_v16  ;;  %v1679_v44 = vadd.f32 %v1677_v32, %v1659_v18 }
 0x45b   :  { %v1683_v53 = vadd.f32 %v1677_v32, %v1663_v45  ;;  %v1682_v51 = vadd.f32 %v1677_v32, %v1662_v48  ;;  %v1685_v2 = vadd.f32 %v1677_v32, %v1665_v5  ;;  %v1684_v58 = vadd.f32 %v1677_v32, %v1664_v4 }
 0x45c   :  { %v3058_v12 = vmax.f32 %v1680_v29, 0.0  ;;  %v3060_v13 = vmax.f32 %v1678_v33, 0.0  ;;  %v3069_v34 = vmax.f32 %v1681_v6, 0.0  ;;  %v3071_v50 = vmax.f32 %v1679_v44, 0.0 }
 0x45d   :  { %v3076_v24 = vmax.f32 %v1683_v53, 0.0  ;;  %v1687_v54 = vadd.f32 %v1677_v32, %v1667_v62  ;;  %v1686_v21 = vadd.f32 %v1677_v32, %v1666_v27  ;;  %v1689_v35 = vadd.f32 %v1677_v32, %v1669_v11 }
 0x45e   :  { %v1712_v41 = vmul.f32 %v3058_v12, %v3058_v12  ;;  %v1710_v55 = vmul.f32 %v3060_v13, %v3060_v13  ;;  %v1688_v42 = vadd.f32 %v1677_v32, %v1668_v63  ;;  %v1691_v30 = vadd.f32 %v1677_v32, %v1671_v46 }
 0x45f   :  { %v1690_v59 = vadd.f32 %v1677_v32, %v1670_v17  ;;  %v1693_v36 = vadd.f32 %v1677_v32, %v1673_v47  ;;  %v1713_v8 = vmul.f32 %v3069_v34, %v3069_v34  ;;  %v1711_v52 = vmul.f32 %v3071_v50, %v3071_v50 }
 0x460   :  { %1730 = vadd.xlane.f32.xlu1 %v1712_v41  ;;  %1726 = vadd.xlane.f32.xlu0 %v1710_v55  ;;  %v3082_v1 = vmax.f32 %v1682_v51, 0.0  ;;  %v1692_v57 = vadd.f32 %v1677_v32, %v1672_v39  ;;  %v1715_v22 = vmul.f32 %v3076_v24, %v3076_v24  ;;  %v3088_v56 = vmax.f32 %v1685_v2, 0.0 }
 0x461   :  { %v3090_v31 = vmax.f32 %v1684_v58, 0.0  ;;  %v3096_v25 = vmax.f32 %v1687_v54, 0.0  ;;  %v3098_v28 = vmax.f32 %v1686_v21, 0.0  ;;  %v3104_v3 = vmax.f32 %v1689_v35, 0.0 }
 0x462   :  { %v1714_v61 = vmul.f32 %v3082_v1, %v3082_v1  ;;  %v1717_v15 = vmul.f32 %v3088_v56, %v3088_v56  ;;  %v3106_v19 = vmax.f32 %v1688_v42, 0.0  ;;  %v3112_v26 = vmax.f32 %v1691_v30, 0.0 }
 0x463   :  { %v1716_v14 = vmul.f32 %v3090_v31, %v3090_v31  ;;  %v1719_v38 = vmul.f32 %v3096_v25, %v3096_v25  ;;  %v1718_v9 = vmul.f32 %v3098_v28, %v3098_v28  ;;  %v1721_v23 = vmul.f32 %v3104_v3, %v3104_v3 }
 0x464   :  { %1732 = vadd.xlane.f32.xlu1 %v1713_v8  ;;  %1728 = vadd.xlane.f32.xlu0 %v1711_v52  ;;  %v1720_v37 = vmul.f32 %v3106_v19, %v3106_v19  ;;  %v3114_v10 = vmax.f32 %v1690_v59, 0.0  ;;  %v1723_v0 = vmul.f32 %v3112_v26, %v3112_v26  ;;  %v3120_v7 = vmax.f32 %v1693_v36, 0.0 }
 0x465   :  { %v3122_v20 = vmax.f32 %v1692_v57, 0.0 }
 0x466   :  { %v1722_v40 = vmul.f32 %v3114_v10, %v3114_v10  ;;  %v1725_v47 = vmul.f32 %v3120_v7, %v3120_v7 }
 0x467   :  { %v1724_v45 = vmul.f32 %v3122_v20, %v3122_v20 }
 0x468   :  { %1736 = vadd.xlane.f32.xlu1 %v1715_v22  ;;  %1734 = vadd.xlane.f32.xlu0 %v1714_v61 }
 0x46c   :  { %1740 = vadd.xlane.f32.xlu1 %v1717_v15  ;;  %1738 = vadd.xlane.f32.xlu0 %v1716_v14 }
 0x470   :  { %1744 = vadd.xlane.f32.xlu1 %v1719_v38  ;;  %1742 = vadd.xlane.f32.xlu0 %v1718_v9 }
 0x474   :  { %1748 = vadd.xlane.f32.xlu1 %v1721_v23  ;;  %1746 = vadd.xlane.f32.xlu0 %v1720_v37 }
 0x478   :  { %1752 = vadd.xlane.f32.xlu1 %v1723_v0  ;;  %1750 = vadd.xlane.f32.xlu0 %v1722_v40 }
 0x47c   :  { %1756 = vadd.xlane.f32.xlu1 %v1725_v47  ;;  %1754 = vadd.xlane.f32.xlu0 %v1724_v45 }
 0x4ed   :  { %v1731_v60 = vpop.xlane.xlu1 %1730  ;;  %v1727_v5 = vpop.xlane.xlu0 %1726 }
 0x4ee   :  { %v1760_v4 = vmax.f32 %v1731_v60, 1e-24  ;;  %v1758_v43 = vmax.f32 %v1727_v5, 1e-24 }
 0x4f0   :  { %2135 = vrsqrt.f32 %v1760_v4 }
 0x4f1   :  { %2137 = vrsqrt.f32 %v1758_v43  ;;  %v1733_v49 = vpop.xlane.xlu1 %1732  ;;  %v1729_v32 = vpop.xlane.xlu0 %1728 }
 0x4f2   :  { %v1761_v16 = vmax.f32 %v1733_v49, 1e-24  ;;  %v1759_v18 = vmax.f32 %v1729_v32, 1e-24 }
 0x4f4   :  { %2139 = vrsqrt.f32 %v1761_v16 }
 0x4f5   :  { %2141 = vrsqrt.f32 %v1759_v18  ;;  %v1737_v39 = vpop.xlane.xlu1 %1736  ;;  %v1735_v48 = vpop.xlane.xlu0 %1734 }
 0x4f6   :  { %v1763_v29 = vmax.f32 %v1737_v39, 1e-24  ;;  %v1762_v33 = vmax.f32 %v1735_v48, 1e-24 }
 0x4f8   :  { %2143 = vrsqrt.f32 %v1763_v29 }
 0x4f9   :  { %2145 = vrsqrt.f32 %v1762_v33  ;;  %v1741_v6 = vpop.xlane.xlu1 %1740  ;;  %v1739_v44 = vpop.xlane.xlu0 %1738 }
 0x4fa   :  { %v2136_v53 = vpop.eup %2135  ;;  %v1765_v51 = vmax.f32 %v1741_v6, 1e-24  ;;  %v1764_v2 = vmax.f32 %v1739_v44, 1e-24 }
 0x4fb   :  { %v2138_v58 = vpop.eup %2137  ;;  %v1792_v62 = vmul.f32 %v2136_v53, %v3058_v12 }
 0x4fc   :  { %v1790_v27 = vmul.f32 %v2138_v58, %v3060_v13  ;;  %2147 = vrsqrt.f32 %v1765_v51 }
 0x4fd   :  { %1808 = vst [vmem:[#allocation10 + $0x10] sm:$0xff] %v1792_v62  ;;  %2149 = vrsqrt.f32 %v1764_v2  ;;  %v1745_v11 = vpop.xlane.xlu1 %1744  ;;  %v1743_v41 = vpop.xlane.xlu0 %1742 }
 0x4fe   :  { %v2140_v55 = vpop.eup %2139  ;;  %1806 = vst [vmem:[#allocation10] sm:$0xff] %v1790_v27  ;;  %v1767_v63 = vmax.f32 %v1745_v11, 1e-24  ;;  %v1766_v46 = vmax.f32 %v1743_v41, 1e-24 }
 0x4ff   :  { %v2142_v17 = vpop.eup %2141  ;;  %v1793_v54 = vmul.f32 %v2140_v55, %v3069_v34 }
 0x500   :  { %v1791_v21 = vmul.f32 %v2142_v17, %v3071_v50  ;;  %2151 = vrsqrt.f32 %v1767_v63 }
 0x501   :  { %1809 = vst [vmem:[#allocation10 + $0x18] sm:$0xff] %v1793_v54  ;;  %2153 = vrsqrt.f32 %v1766_v46  ;;  %v1749_v12 = vpop.xlane.xlu1 %1748  ;;  %v1747_v35 = vpop.xlane.xlu0 %1746 }
 0x502   :  { %v2144_v13 = vpop.eup %2143  ;;  %1807 = vst [vmem:[#allocation10 + $0x8] sm:$0xff] %v1791_v21  ;;  %v1769_v42 = vmax.f32 %v1749_v12, 1e-24  ;;  %v1768_v30 = vmax.f32 %v1747_v35, 1e-24 }
 0x503   :  { %v2146_v59 = vpop.eup %2145  ;;  %v1795_v36 = vmul.f32 %v2144_v13, %v3076_v24 }
 0x504   :  { %v1794_v8 = vmul.f32 %v2146_v59, %v3082_v1  ;;  %2155 = vrsqrt.f32 %v1769_v42 }
 0x505   :  { %1811 = vst [vmem:[#allocation10 + $0x28] sm:$0xff] %v1795_v36  ;;  %2157 = vrsqrt.f32 %v1768_v30  ;;  %v1753_v34 = vpop.xlane.xlu1 %1752  ;;  %v1751_v52 = vpop.xlane.xlu0 %1750 }
 0x506   :  { %v2148_v50 = vpop.eup %2147  ;;  %1810 = vst [vmem:[#allocation10 + $0x20] sm:$0xff] %v1794_v8  ;;  %v1771_v57 = vmax.f32 %v1753_v34, 1e-24  ;;  %v1770_v22 = vmax.f32 %v1751_v52, 1e-24 }
 0x507   :  { %v2150_v61 = vpop.eup %2149  ;;  %v1797_v15 = vmul.f32 %v2148_v50, %v3088_v56 }
 0x508   :  { %v1796_v14 = vmul.f32 %v2150_v61, %v3090_v31  ;;  %2159 = vrsqrt.f32 %v1771_v57 }
 0x509   :  { %1813 = vst [vmem:[#allocation10 + $0x38] sm:$0xff] %v1797_v15  ;;  %2161 = vrsqrt.f32 %v1770_v22  ;;  %v1757_v24 = vpop.xlane.xlu1 %1756  ;;  %v1755_v38 = vpop.xlane.xlu0 %1754 }
 0x50a   :  { %v2152_v1 = vpop.eup %2151  ;;  %1812 = vst [vmem:[#allocation10 + $0x30] sm:$0xff] %v1796_v14  ;;  %v1773_v9 = vmax.f32 %v1757_v24, 1e-24  ;;  %v1772_v23 = vmax.f32 %v1755_v38, 1e-24 }
 0x50b   :  { %v2154_v37 = vpop.eup %2153  ;;  %v1799_v0 = vmul.f32 %v2152_v1, %v3096_v25 }
 0x50c   :  { %v1798_v40 = vmul.f32 %v2154_v37, %v3098_v28  ;;  %2163 = vrsqrt.f32 %v1773_v9 }
 0x50d   :  { %1815 = vst [vmem:[#allocation10 + $0x48] sm:$0xff] %v1799_v0  ;;  %2165 = vrsqrt.f32 %v1772_v23 }
 0x50e   :  { %v2156_v56 = vpop.eup %2155  ;;  %1814 = vst [vmem:[#allocation10 + $0x40] sm:$0xff] %v1798_v40 }
 0x50f   :  { %v2158_v31 = vpop.eup %2157  ;;  %v1801_v47 = vmul.f32 %v2156_v56, %v3104_v3 }
 0x510   :  { %v1800_v45 = vmul.f32 %v2158_v31, %v3106_v19 }
 0x511   :  { %1817 = vst [vmem:[#allocation10 + $0x58] sm:$0xff] %v1801_v47 }
 0x512   :  { %v2160_v60 = vpop.eup %2159  ;;  %1816 = vst [vmem:[#allocation10 + $0x50] sm:$0xff] %v1800_v45 }
 0x513   :  { %v2162_v5 = vpop.eup %2161  ;;  %v1803_v4 = vmul.f32 %v2160_v60, %v3112_v26 }
 0x514   :  { %v1802_v25 = vmul.f32 %v2162_v5, %v3114_v10 }
 0x515   :  { %1819 = vst [vmem:[#allocation10 + $0x68] sm:$0xff] %v1803_v4 }
 0x516   :  { %v2164_v28 = vpop.eup %2163  ;;  %1818 = vst [vmem:[#allocation10 + $0x60] sm:$0xff] %v1802_v25 }
 0x517   :  { %v2166_v43 = vpop.eup %2165  ;;  %v1805_v49 = vmul.f32 %v2164_v28, %v3120_v7 }
 0x518   :  { %v1804_v3 = vmul.f32 %v2166_v43, %v3122_v20 }
 0x519   :  { %1821 = vst [vmem:[#allocation10 + $0x78] sm:$0xff] %v1805_v49 }
 0x51a   :  { %1820 = vst [vmem:[#allocation10 + $0x70] sm:$0xff] %v1804_v3 }
 0x51b   :  { %2266 = shalt.err (!%p2263_p8)
}
 0x51c   :  { %s2267_s17 = scalar_lea.hbm %s3166_s7, 2048 }
 0x51d   :  { %p2268_p9 = scmp.ne.s32.totalorder %s3166_s7, %s2267_s17  ;;  %p2271_p10 = scmp.lt.u32.totalorder %s2267_s17, %s3166_s7 }
 0x51f   :  { %p2273_p11 = pnand %p2271_p10, %p2268_p9 }
 0x521   :  { %2276 = shalt.err (!%p2273_p11)
}
 0x522   :  { %1833 = dma.vmem_to_hbm [thread:$0]  %s1828_s10, 2048, %s3166_s7, [#allocation4], %s2286_s11, %s2286_s11, %s2287_s12  }
 0x523   :  { %2283 = dma.done.wait [#allocation4], 2048  }
 0x524   :  { %2284 = vsyncadd [#allocation4], 4294965248 }
 0x525   :  { %1837 = vsyncpa [#allocation3], 1 }
 0x526   :  { %1838 = vsyncpa [#allocation6], 1 }
 0x527   :  { %1839 = vsyncpa [#allocation9], 1 }
 0x528   :  { %1840 = vsyncpa [#allocation4], 1 }

</bundles_post_ra>
